<compile_context>
chip_gen: v5e
topology: v5e:2x2
jax: 0.10.0
libtpu: 0.0.40
codegen_flags: <defaults>
</compile_context>

<pallas_src>
import numpy as np
import jax
import jax.numpy as jnp
from jax import lax
from jax.experimental import pallas as pl
from jax.experimental.pallas import tpu as pltpu

# ----------------------- small, module-consistent config ---------------------
B = 2            # batch size
T = 8            # time_length
D = 16           # input_dim (features)
Z = 8            # latent_dim
ENC = (32, 32)   # encoder_sizes
DEC = (32, 32)   # decoder_sizes
KSZ = 3          # window_size (Conv1d kernel size; odd -> symmetric padding)
BETA = 1.0
M = 1
K = 1
KERNEL = "cauchy"
SIGMA = 1.0
LENGTH_SCALE = 7.0
KERNEL_SCALES = 1

NB = B * M * K          # effective batch after MC / IW tiling
BT = NB * T             # rows of the packed data / output slabs
LANES = 128             # lane-dense slab width

# ---- packed INPUT slab lane layout (one HBM->VMEM DMA for all data) ----
X_C = 0                 # x_flat            lanes [0, D)
M_C = D                 # missing mask      lanes [D, 2D)
EPS_C = 2 * D           # eps ~ N(0,1)      lanes [2D, 2D+Z)

# ---- packed OUTPUT slab lane layout (one VMEM->HBM DMA for all results) ----
IMP_C = 0               # imputed data      lanes [0, D)
MU_C = D                # encoder mean      lanes [D, D+Z)
V_C = D + Z             # V = U^{-1}:  V[b,z,i,j] at row b*T+j, lane V_C+i*Z+z
NLL_C = D + Z + T * Z   # per-row masked NLL (1 lane)
assert NLL_C + 1 <= LANES and EPS_C + Z <= LANES

# ---- packed WEIGHT slab row layout (8-aligned row offsets, 128 lanes) ----
def _align8(n):
    return ((n + 7) // 8) * 8

_r = 0
WC_R, _r = _r, _r + _align8(KSZ * D)   # conv weight  (KSZ*D, ENC0), tap-major [t-1 | t | t+1]
BC_R, _r = _r, _r + 8                  # conv bias    (ENC0,)
W1_R, _r = _r, _r + _align8(ENC[0])    # linear1      (ENC0, ENC1)
B1_R, _r = _r, _r + 8
WH_R, _r = _r, _r + _align8(ENC[1])    # head         (ENC1, 3Z), cols [mu | diag | superdiag]
BH_R, _r = _r, _r + 8
WD1_R, _r = _r, _r + _align8(Z)        # decoder l1   (Z, DEC0)
BD1_R, _r = _r, _r + 8
WD2_R, _r = _r, _r + _align8(DEC[0])   # decoder l2   (DEC0, DEC1)
BD2_R, _r = _r, _r + 8
WD3_R, _r = _r, _r + _align8(DEC[1])   # decoder out  (DEC1, D)
BD3_R, _r = _r, _r + 8
W_ROWS = _r


# ------------------------------ fused Pallas kernel ---------------------------
def _gpvae_fused_kernel(data_ref, w_ref, out_ref, delta_sc):
    """encoder -> q(z|x) -> rsample -> decoder -> NLL + imputation, fully fused.

    data_ref: (BT, 128) packed [x | mask | eps]       (rows ordered (b, t))
    w_ref:    (W_ROWS, 128) packed weights/biases
    out_ref:  (BT, 128) packed [imputed | mu | V-rows | row-NLL]
    delta_sc: (NB, T, Z) VMEM scratch for the reparameterized sample offset
    """
    f32 = jnp.float32

    x = data_ref[0:BT, X_C:X_C + D]                     # (BT, D)
    m = data_ref[0:BT, M_C:M_C + D]                     # (BT, D)
    eps = data_ref[0:BT, EPS_C:EPS_C + Z]               # (BT, Z)

    out_ref[...] = jnp.zeros_like(out_ref)              # deterministic padding lanes

    # -------- encoder Conv1d(k=3, pad=1) over time: two XLU rolls + ONE matmul
    tmod = lax.broadcasted_iota(jnp.int32, (BT, D), 0) % T
    x_prev = jnp.where(tmod == 0, 0.0, pltpu.roll(x, shift=1, axis=0))        # x[t-1], 0 at t=0
    x_next = jnp.where(tmod == T - 1, 0.0, pltpu.roll(x, shift=BT - 1, axis=0))  # x[t+1], 0 at t=T-1
    xcat = jnp.concatenate([x_prev, x, x_next], axis=1)                        # (BT, 3D) im2col in VMEM

    h0 = jnp.dot(xcat, w_ref[WC_R:WC_R + KSZ * D, 0:ENC[0]],
                 preferred_element_type=f32) + w_ref[BC_R:BC_R + 1, 0:ENC[0]]
    h1 = jnp.maximum(jnp.dot(h0, w_ref[W1_R:W1_R + ENC[0], 0:ENC[1]],
                             preferred_element_type=f32)
                     + w_ref[B1_R:B1_R + 1, 0:ENC[1]], 0.0)
    head = jnp.dot(h1, w_ref[WH_R:WH_R + ENC[1], 0:3 * Z],
                   preferred_element_type=f32) + w_ref[BH_R:BH_R + 1, 0:3 * Z]  # (BT, 3Z)

    mu = head[:, 0:Z]                                          # (BT, Z)
    dia = 1.0 / (1.0 + jnp.exp(-head[:, Z:2 * Z])) + 1.0       # U[t,t]   = sigmoid + 1
    sup = 1.0 / (1.0 + jnp.exp(-head[:, 2 * Z:3 * Z]))         # U[t,t+1] = sigmoid
    dinv = 1.0 / dia
    cmul = -(sup * dinv)

    # (NB, T, Z) views: batch leading, time on sublanes, latent on lanes (free reshape)
    eps3 = eps.reshape(NB, T, Z)
    dinv3 = dinv.reshape(NB, T, Z)
    sup3 = sup.reshape(NB, T, Z)
    c3 = cmul.reshape(NB, T, Z)

    # -------- rsample: delta = U^{-T} eps (forward substitution over time)
    y = eps3[:, 0:1, :] * dinv3[:, 0:1, :]
    delta_sc[:, 0:1, :] = y
    for t in range(1, T):
        y = (eps3[:, t:t + 1, :] - sup3[:, t - 1:t, :] * y) * dinv3[:, t:t + 1, :]
        delta_sc[:, t:t + 1, :] = y
    delta = delta_sc[...].reshape(BT, Z)

    # -------- V = U^{-1} (upper triangular), back-substitution row recursion:
    #   V[T-1,:] = e_{T-1}/d_{T-1};  V[i,:] = c_i * V[i+1,:] + e_i/d_i
    # Per step i the value layout is (NB, T_j, Z); it is stored directly into
    # the output slab at rows (b*T + j), lanes V_C + i*Z + z.
    j_iota = lax.broadcasted_iota(jnp.int32, (NB, T, Z), 1)
    r = jnp.zeros((NB, T, Z), f32)
    for i in range(T - 1, -1, -1):
        r = c3[:, i:i + 1, :] * r + jnp.where(j_iota == i, dinv3[:, i:i + 1, :], 0.0)
        rg = jnp.where(jnp.isfinite(r), r, 0.0)                # reference's finite guard
        out_ref[0:BT, V_C + i * Z:V_C + (i + 1) * Z] = rg.reshape(BT, Z)

    # -------- decoder: sample path + mean path stacked into ONE pass
    dec_in = jnp.concatenate([mu + delta, mu], axis=0)         # (2*BT, Z)
    a1 = jnp.maximum(jnp.dot(dec_in, w_ref[WD1_R:WD1_R + Z, 0:DEC[0]],
                             preferred_element_type=f32)
                     + w_ref[BD1_R:BD1_R + 1, 0:DEC[0]], 0.0)
    a2 = jnp.maximum(jnp.dot(a1, w_ref[WD2_R:WD2_R + DEC[0], 0:DEC[1]],
                             preferred_element_type=f32)
                     + w_ref[BD2_R:BD2_R + 1, 0:DEC[1]], 0.0)
    dec_out = jnp.dot(a2, w_ref[WD3_R:WD3_R + DEC[1], 0:D],
                      preferred_element_type=f32) + w_ref[BD3_R:BD3_R + 1, 0:D]  # (2*BT, D)
    px_mu = dec_out[0:BT, :]            # decode(z).mean
    px_mu_mean = dec_out[BT:2 * BT, :]  # decode(q.mean).mean

    # -------- masked unit-variance Gaussian NLL per row, imputation, mu
    nll = 0.5 * (x - px_mu) ** 2 + 0.5 * jnp.log(2.0 * jnp.pi)
    nll = jnp.where(jnp.isfinite(nll), nll, 0.0)
    nll = jnp.where(m > 0.5, nll, 0.0)
    out_ref[0:BT, NLL_C:NLL_C + 1] = jnp.sum(nll, axis=1, keepdims=True)
    out_ref[0:BT, MU_C:MU_C + Z] = mu
    out_ref[0:BT, IMP_C:IMP_C + D] = px_mu_mean * (1.0 - m) + x * m


def gpvae_fused_call(w_slab, x_flat, m_flat, eps):
    # one lane-dense input slab (1 DMA) + one packed weight slab (1 DMA)
    pad = jnp.zeros((BT, LANES - (EPS_C + Z)), jnp.float32)
    data = jnp.concatenate([x_flat, m_flat, eps, pad], axis=1)      # (BT, 128)
    out = pl.pallas_call(
        _gpvae_fused_kernel,
        out_shape=jax.ShapeDtypeStruct((BT, LANES), jnp.float32),
        scratch_shapes=[pltpu.VMEM((NB, T, Z), jnp.float32)],
        input_output_aliases={0: 0},   # reuse the data-slab HBM buffer for the result slab
    )(data, w_slab)
    imputed = out[:, IMP_C:IMP_C + D]
    mu = out[:, MU_C:MU_C + Z]
    v_flat = out[:, V_C:V_C + T * Z]
    row_nll = out[:, NLL_C]
    return imputed, mu, v_flat, row_nll


# ------------------------------- JAX glue ------------------------------------
def cauchy_kernel(t, sigma, length_scale):
    xs = jnp.arange(t, dtype=jnp.float32)
    d2 = (xs[None, :] - xs[:, None]) ** 2
    km = sigma / (d2 / (length_scale ** 2) + 1.0)
    return km + 0.001 * jnp.eye(t, dtype=jnp.float32)


def rbf_kernel(t, length_scale):
    xs = jnp.arange(t, dtype=jnp.float32)
    d2 = (xs[None, :] - xs[:, None]) ** 2
    return jnp.exp(-d2 / (length_scale ** 2))


def matern_kernel(t, length_scale):
    xs = jnp.arange(t, dtype=jnp.float32)
    d = jnp.abs(xs[None, :] - xs[:, None])
    return jnp.exp(-d / jnp.sqrt(length_scale))


def build_prior_scale_tril(time_length, latent_dim, kernel, sigma, length_scale, kernel_scales):
    mats = []
    for i in range(kernel_scales):
        ls = length_scale / 2 ** i
        if kernel == "cauchy":
            mats.append(cauchy_kernel(time_length, sigma, ls))
        elif kernel == "rbf":
            mats.append(rbf_kernel(time_length, ls))
        elif kernel == "matern":
            mats.append(matern_kernel(time_length, ls))
        else:
            # TODO(synk): diffusion kernel (tridiagonal construction) not implemented here.
            raise NotImplementedError(kernel)
    tiled = []
    total = 0
    for i in range(kernel_scales):
        if i == kernel_scales - 1:
            multiplier = latent_dim - total
        else:
            multiplier = int(np.ceil(latent_dim / kernel_scales))
            total += multiplier
        tiled.append(jnp.tile(mats[i][None], (multiplier, 1, 1)))
    kernel_matrix_tiled = jnp.concatenate(tiled, axis=0)           # [Z, T, T]
    return jnp.linalg.cholesky(kernel_matrix_tiled)                # lower-tri [Z, T, T]


def kl_mvn(loc_q, scale_tril_q, scale_tril_p):
    """KL( N(loc_q, Lq Lq^T) || N(0, Lp Lp^T) ), batched over [B, Z], event dim T."""
    t = loc_q.shape[-1]
    logdet_lp = jnp.sum(jnp.log(jnp.diagonal(scale_tril_p, axis1=-2, axis2=-1)), axis=-1)   # [Z]
    logdet_lq = jnp.sum(jnp.log(jnp.diagonal(scale_tril_q, axis1=-2, axis2=-1)), axis=-1)   # [B, Z]
    lp_b = jnp.broadcast_to(scale_tril_p[None], scale_tril_q.shape)
    mm = jax.lax.linalg.triangular_solve(lp_b, scale_tril_q, left_side=True, lower=True)
    term2 = jnp.sum(mm ** 2, axis=(-1, -2))
    y = jax.lax.linalg.triangular_solve(lp_b, loc_q[..., None], left_side=True, lower=True)[..., 0]
    term3 = jnp.sum(y ** 2, axis=-1)
    return (logdet_lp[None, :] - logdet_lq) + 0.5 * (term2 + term3 - t)


def _init_params(key):
    """Random init, packed offline into the single (W_ROWS, 128) f32 weight slab.

    The head weight columns are laid out [mu | diag | superdiag] — a static,
    offline permutation of the reference's interleaved logvar channels.
    """
    def dense(k, fan_in, fan_out):
        k1, k2 = jax.random.split(k)
        w = jax.random.normal(k1, (fan_in, fan_out), jnp.float32) / jnp.sqrt(float(fan_in))
        b = 0.01 * jax.random.normal(k2, (fan_out,), jnp.float32)
        return w, b

    keys = jax.random.split(key, 6)
    layers = [
        (WC_R, BC_R, dense(keys[0], KSZ * D, ENC[0])),   # CustomConv1d(D->ENC0, k=KSZ)
        (W1_R, B1_R, dense(keys[1], ENC[0], ENC[1])),    # Linear + ReLU
        (WH_R, BH_R, dense(keys[2], ENC[1], 3 * Z)),     # merged [mu | diag | superdiag] head
        (WD1_R, BD1_R, dense(keys[3], Z, DEC[0])),       # decoder Linear + ReLU
        (WD2_R, BD2_R, dense(keys[4], DEC[0], DEC[1])),  # decoder Linear + ReLU
        (WD3_R, BD3_R, dense(keys[5], DEC[1], D)),       # decoder output Linear
    ]
    slab = jnp.zeros((W_ROWS, LANES), jnp.float32)
    for wr, br, (w, bvec) in layers:
        slab = slab.at[wr:wr + w.shape[0], 0:w.shape[1]].set(w)
        slab = slab.at[br, 0:bvec.shape[0]].set(bvec)
    return slab


def gpvae_forward(w_slab, x, m_mask, rng, training=True):
    # x, m_mask: [B, T, D] float32 (mask: 1.0 observed, 0.0 missing)
    x = jnp.tile(x, (M * K, 1, 1))
    m_mask = jnp.tile(m_mask, (M * K, 1, 1))

    x_flat = x.reshape(BT, D)
    m_flat = m_mask.reshape(BT, D)
    eps = jax.random.normal(rng, (BT, Z), jnp.float32)   # rows (b, t), lanes z

    # ---- fused hot path: encoder -> q(z|x) -> sample -> decoder -> NLL/impute ----
    imputed_flat, mu_flat, v_flat, row_nll = gpvae_fused_call(w_slab, x_flat, m_flat, eps)

    imputed_data = imputed_flat.reshape(NB, T, D)
    nll = row_nll.reshape(NB, T).sum(axis=1)                                   # [B]

    # ---- KL vs GP prior: tiny batched T x T solves kept in plain JAX glue ----
    # TODO(synk): batched GP-prior Cholesky + MVN KL triangular solves stay in plain JAX.
    mapped_mean = jnp.transpose(mu_flat.reshape(NB, T, Z), (0, 2, 1))          # [B, Z, T]
    v = v_flat.reshape(NB, T, T, Z)                     # axes (b, j, i, z), see kernel layout
    cov_tril = jnp.transpose(v, (0, 3, 2, 1))           # U^{-1}, upper-tri, [B, Z, T, T]
    cov_tril_lower = jnp.swapaxes(cov_tril, -1, -2)     # scale_tril of q

    prior_scale_tril = build_prior_scale_tril(T, Z, KERNEL, SIGMA, LENGTH_SCALE, KERNEL_SCALES)
    kl = kl_mvn(mapped_mean, cov_tril_lower, prior_scale_tril)                 # [B, Z]
    kl = jnp.where(jnp.isfinite(kl), kl, jnp.zeros_like(kl))
    kl = jnp.sum(kl, axis=1)                                                   # [B]

    elbo = jnp.mean(-nll - BETA * kl)
    loss = -elbo

    if not training:
        return {"imputed_data": imputed_data}
    return {"loss": loss, "imputed_data": imputed_data}


# --------------------------------- main ---------------------------------------
if __name__ == "__main__":
    key = jax.random.PRNGKey(0)
    kx, km, kz = jax.random.split(key, 3)
    x = jax.random.normal(kx, (B, T, D), jnp.float32)
    missing_mask = (jax.random.uniform(km, (B, T, D)) > 0.3).astype(jnp.float32)
    x = x * missing_mask  # zero-out missing entries, as GPVAE data pipelines do

    w_slab = _init_params(jax.random.PRNGKey(42))

    fwd = jax.jit(gpvae_forward, static_argnames=("training",))
    out = fwd(w_slab, x, missing_mask, kz, training=True)
    out = jax.tree_util.tree_map(jax.block_until_ready, out)

    assert out["imputed_data"].shape == (NB, T, D)
    assert bool(jnp.isfinite(out["loss"]))
    print("KERNEL_OK")
</pallas_src>

<mosaic_0001>
module attributes {stable_mosaic.version = 11 : i64} {
  func.func @_gpvae_fused_kernel(%arg0: memref<16x128xf32, #tpu.memory_space<vmem>>, %arg1: memref<232x128xf32, #tpu.memory_space<vmem>>, %arg2: memref<16x128xf32, #tpu.memory_space<vmem>>, %arg3: memref<2x8x8xf32, #tpu.memory_space<vmem>>) attributes {dimension_semantics = [], scalar_prefetch = 0 : i64, scratch_operands = 1 : i64, tpu.core_type = #tpu.core_type<tc>} {
    %c0 = arith.constant 0 : index
    %c0_0 = arith.constant 0 : index
    %0 = vector.load %arg0[%c0, %c0_0] : memref<16x128xf32, #tpu.memory_space<vmem>>, vector<16x16xf32>
    %c0_1 = arith.constant 0 : index
    %c16 = arith.constant 16 : index
    %1 = vector.load %arg0[%c0_1, %c16] : memref<16x128xf32, #tpu.memory_space<vmem>>, vector<16x16xf32>
    %c0_2 = arith.constant 0 : index
    %c32 = arith.constant 32 : index
    %2 = vector.load %arg0[%c0_2, %c32] : memref<16x128xf32, #tpu.memory_space<vmem>>, vector<16x8xf32>
    %cst = arith.constant 0.000000e+00 : f32
    %3 = vector.broadcast %cst : f32 to vector<16x128xf32>
    %c0_3 = arith.constant 0 : index
    %c0_4 = arith.constant 0 : index
    %4 = vector.load %arg2[%c0_3, %c0_4] : memref<16x128xf32, #tpu.memory_space<vmem>>, vector<16x128xf32>
    tpu.vector_store %arg2[%c0_3, %c0_4], %3 {strides = array<i32>} : memref<16x128xf32, #tpu.memory_space<vmem>>, vector<16x128xf32>,
    %5 = tpu.iota {dimensions = array<i32: 0>} : vector<16x16xi32>
    %c8_i32 = arith.constant 8 : i32
    %c0_i32 = arith.constant 0 : i32
    %6 = arith.cmpi eq, %c8_i32, %c0_i32 : i32
    %c1_i32 = arith.constant 1 : i32
    %7 = arith.select %6, %c1_i32, %c8_i32 : i32
    %8 = vector.broadcast %7 : i32 to vector<16x16xi32>
    %9 = arith.remsi %5, %8 : vector<16x16xi32>
    %c0_i32_5 = arith.constant 0 : i32
    %10 = vector.broadcast %c0_i32_5 : i32 to vector<16x16xi32>
    %11 = arith.cmpi ne, %9, %10 : vector<16x16xi32>
    %c0_i32_6 = arith.constant 0 : i32
    %12 = vector.broadcast %c0_i32_6 : i32 to vector<16x16xi32>
    %13 = arith.cmpi slt, %9, %12 : vector<16x16xi32>
    %c0_i32_7 = arith.constant 0 : i32
    %14 = arith.cmpi slt, %7, %c0_i32_7 : i32
    %15 = vector.broadcast %14 : i1 to vector<16x16xi1>
    %16 = vector.broadcast %15 : vector<16x16xi1> to vector<16x16xi1>
    %17 = arith.xori %13, %16 : vector<16x16xi1>
    %18 = arith.andi %17, %11 : vector<16x16xi1>
    %19 = vector.broadcast %7 : i32 to vector<16x16xi32>
    %20 = arith.addi %9, %19 : vector<16x16xi32>
    %21 = arith.select %18, %20, %9 : vector<16x16xi1>, vector<16x16xi32>
    %c0_i32_8 = arith.constant 0 : i32
    %22 = vector.broadcast %c0_i32_8 : i32 to vector<16x16xi32>
    %23 = arith.cmpi eq, %21, %22 : vector<16x16xi32>
    %c1_i32_9 = arith.constant 1 : i32
    %24 = tpu.dynamic_rotate %0 by %c1_i32_9 dim 0 : vector<16x16xf32>, i32 -> vector<16x16xf32>
    %cst_10 = arith.constant 0.000000e+00 : f32
    %25 = vector.broadcast %cst_10 : f32 to vector<16x16xf32>
    %26 = arith.select %23, %25, %24 : vector<16x16xi1>, vector<16x16xf32>
    %c7_i32 = arith.constant 7 : i32
    %27 = vector.broadcast %c7_i32 : i32 to vector<16x16xi32>
    %28 = arith.cmpi eq, %21, %27 : vector<16x16xi32>
    %c15_i32 = arith.constant 15 : i32
    %29 = tpu.dynamic_rotate %0 by %c15_i32 dim 0 : vector<16x16xf32>, i32 -> vector<16x16xf32>
    %cst_11 = arith.constant 0.000000e+00 : f32
    %30 = vector.broadcast %cst_11 : f32 to vector<16x16xf32>
    %31 = arith.select %28, %30, %29 : vector<16x16xi1>, vector<16x16xf32>
    %32 = tpu.concatenate %26, %0, %31 in 1 : vector<16x16xf32>, vector<16x16xf32>, vector<16x16xf32> -> vector<16x48xf32>
    %c0_12 = arith.constant 0 : index
    %c0_13 = arith.constant 0 : index
    %33 = vector.load %arg1[%c0_12, %c0_13] : memref<232x128xf32, #tpu.memory_space<vmem>>, vector<48x32xf32>
    %cst_14 = arith.constant dense<0.000000e+00> : vector<16x32xf32>
    %34 = tpu.matmul %32, %33, %cst_14 {dimension_numbers = #tpu.dot_dimension_numbers<[1], [0], [0], [1], [0, 0, 1, 1], [], []>} : vector<16x48xf32>, vector<48x32xf32>, vector<16x32xf32> -> vector<16x32xf32>
    %c48 = arith.constant 48 : index
    %c0_15 = arith.constant 0 : index
    %35 = vector.load %arg1[%c48, %c0_15] : memref<232x128xf32, #tpu.memory_space<vmem>>, vector<1x32xf32>
    %36 = vector.broadcast %35 : vector<1x32xf32> to vector<16x32xf32>
    %37 = arith.addf %34, %36 : vector<16x32xf32>
    %c56 = arith.constant 56 : index
    %c0_16 = arith.constant 0 : index
    %38 = vector.load %arg1[%c56, %c0_16] : memref<232x128xf32, #tpu.memory_space<vmem>>, vector<32x32xf32>
    %cst_17 = arith.constant dense<0.000000e+00> : vector<16x32xf32>
    %39 = tpu.matmul %37, %38, %cst_17 {dimension_numbers = #tpu.dot_dimension_numbers<[1], [0], [0], [1], [0, 0, 1, 1], [], []>} : vector<16x32xf32>, vector<32x32xf32>, vector<16x32xf32> -> vector<16x32xf32>
    %c88 = arith.constant 88 : index
    %c0_18 = arith.constant 0 : index
    %40 = vector.load %arg1[%c88, %c0_18] : memref<232x128xf32, #tpu.memory_space<vmem>>, vector<1x32xf32>
    %41 = vector.broadcast %40 : vector<1x32xf32> to vector<16x32xf32>
    %42 = arith.addf %39, %41 : vector<16x32xf32>
    %cst_19 = arith.constant 0.000000e+00 : f32
    %43 = vector.broadcast %cst_19 : f32 to vector<16x32xf32>
    %44 = arith.maximumf %42, %43 : vector<16x32xf32>
    %c96 = arith.constant 96 : index
    %c0_20 = arith.constant 0 : index
    %45 = vector.load %arg1[%c96, %c0_20] : memref<232x128xf32, #tpu.memory_space<vmem>>, vector<32x24xf32>
    %cst_21 = arith.constant dense<0.000000e+00> : vector<16x24xf32>
    %46 = tpu.matmul %44, %45, %cst_21 {dimension_numbers = #tpu.dot_dimension_numbers<[1], [0], [0], [1], [0, 0, 1, 1], [], []>} : vector<16x32xf32>, vector<32x24xf32>, vector<16x24xf32> -> vector<16x24xf32>
    %c128 = arith.constant 128 : index
    %c0_22 = arith.constant 0 : index
    %47 = vector.load %arg1[%c128, %c0_22] : memref<232x128xf32, #tpu.memory_space<vmem>>, vector<1x24xf32>
    %48 = vector.broadcast %47 : vector<1x24xf32> to vector<16x24xf32>
    %49 = arith.addf %46, %48 : vector<16x24xf32>
    %50 = vector.extract_strided_slice %49 {offsets = [0, 0], sizes = [16, 8], strides = [1, 1]} : vector<16x24xf32> to vector<16x8xf32>
    %51 = vector.extract_strided_slice %49 {offsets = [0, 8], sizes = [16, 8], strides = [1, 1]} : vector<16x24xf32> to vector<16x8xf32>
    %cst_23 = arith.constant 0.000000e+00 : f32
    %52 = vector.broadcast %cst_23 : f32 to vector<16x8xf32>
    %53 = arith.subf %52, %51 : vector<16x8xf32>
    %54 = math.exp %53 : vector<16x8xf32>
    %cst_24 = arith.constant 1.000000e+00 : f32
    %55 = vector.broadcast %cst_24 : f32 to vector<16x8xf32>
    %56 = arith.addf %55, %54 : vector<16x8xf32>
    %cst_25 = arith.constant 1.000000e+00 : f32
    %57 = vector.broadcast %cst_25 : f32 to vector<16x8xf32>
    %58 = arith.divf %57, %56 : vector<16x8xf32>
    %cst_26 = arith.constant 1.000000e+00 : f32
    %59 = vector.broadcast %cst_26 : f32 to vector<16x8xf32>
    %60 = arith.addf %58, %59 : vector<16x8xf32>
    %61 = vector.extract_strided_slice %49 {offsets = [0, 16], sizes = [16, 8], strides = [1, 1]} : vector<16x24xf32> to vector<16x8xf32>
    %cst_27 = arith.constant 0.000000e+00 : f32
    %62 = vector.broadcast %cst_27 : f32 to vector<16x8xf32>
    %63 = arith.subf %62, %61 : vector<16x8xf32>
    %64 = math.exp %63 : vector<16x8xf32>
    %cst_28 = arith.constant 1.000000e+00 : f32
    %65 = vector.broadcast %cst_28 : f32 to vector<16x8xf32>
    %66 = arith.addf %65, %64 : vector<16x8xf32>
    %cst_29 = arith.constant 1.000000e+00 : f32
    %67 = vector.broadcast %cst_29 : f32 to vector<16x8xf32>
    %68 = arith.divf %67, %66 : vector<16x8xf32>
    %cst_30 = arith.constant 1.000000e+00 : f32
    %69 = vector.broadcast %cst_30 : f32 to vector<16x8xf32>
    %70 = arith.divf %69, %60 : vector<16x8xf32>
    %71 = arith.mulf %68, %70 : vector<16x8xf32>
    %cst_31 = arith.constant 0.000000e+00 : f32
    %72 = vector.broadcast %cst_31 : f32 to vector<16x8xf32>
    %73 = arith.subf %72, %71 : vector<16x8xf32>
    %74 = vector.shape_cast %2 : vector<16x8xf32> to vector<2x8x8xf32>
    %75 = vector.shape_cast %70 : vector<16x8xf32> to vector<2x8x8xf32>
    %76 = vector.shape_cast %68 : vector<16x8xf32> to vector<2x8x8xf32>
    %77 = vector.shape_cast %73 : vector<16x8xf32> to vector<2x8x8xf32>
    %78 = vector.extract_strided_slice %74 {offsets = [0, 0, 0], sizes = [2, 1, 8], strides = [1, 1, 1]} : vector<2x8x8xf32> to vector<2x1x8xf32>
    %79 = vector.extract_strided_slice %75 {offsets = [0, 0, 0], sizes = [2, 1, 8], strides = [1, 1, 1]} : vector<2x8x8xf32> to vector<2x1x8xf32>
    %80 = arith.mulf %78, %79 : vector<2x1x8xf32>
    %c0_32 = arith.constant 0 : index
    %c0_33 = arith.constant 0 : index
    %c0_34 = arith.constant 0 : index
    %81 = vector.load %arg3[%c0_32, %c0_33, %c0_34] : memref<2x8x8xf32, #tpu.memory_space<vmem>>, vector<2x1x8xf32>
    tpu.vector_store %arg3[%c0_32, %c0_33, %c0_34], %80 {strides = array<i32>} : memref<2x8x8xf32, #tpu.memory_space<vmem>>, vector<2x1x8xf32>,
    %82 = vector.extract_strided_slice %74 {offsets = [0, 1, 0], sizes = [2, 1, 8], strides = [1, 1, 1]} : vector<2x8x8xf32> to vector<2x1x8xf32>
    %83 = vector.extract_strided_slice %76 {offsets = [0, 0, 0], sizes = [2, 1, 8], strides = [1, 1, 1]} : vector<2x8x8xf32> to vector<2x1x8xf32>
    %84 = arith.mulf %83, %80 : vector<2x1x8xf32>
    %85 = arith.subf %82, %84 : vector<2x1x8xf32>
    %86 = vector.extract_strided_slice %75 {offsets = [0, 1, 0], sizes = [2, 1, 8], strides = [1, 1, 1]} : vector<2x8x8xf32> to vector<2x1x8xf32>
    %87 = arith.mulf %85, %86 : vector<2x1x8xf32>
    %c0_35 = arith.constant 0 : index
    %c1 = arith.constant 1 : index
    %c0_36 = arith.constant 0 : index
    %88 = vector.load %arg3[%c0_35, %c1, %c0_36] : memref<2x8x8xf32, #tpu.memory_space<vmem>>, vector<2x1x8xf32>
    tpu.vector_store %arg3[%c0_35, %c1, %c0_36], %87 {strides = array<i32>} : memref<2x8x8xf32, #tpu.memory_space<vmem>>, vector<2x1x8xf32>,
    %89 = vector.extract_strided_slice %74 {offsets = [0, 2, 0], sizes = [2, 1, 8], strides = [1, 1, 1]} : vector<2x8x8xf32> to vector<2x1x8xf32>
    %90 = vector.extract_strided_slice %76 {offsets = [0, 1, 0], sizes = [2, 1, 8], strides = [1, 1, 1]} : vector<2x8x8xf32> to vector<2x1x8xf32>
    %91 = arith.mulf %90, %87 : vector<2x1x8xf32>
    %92 = arith.subf %89, %91 : vector<2x1x8xf32>
    %93 = vector.extract_strided_slice %75 {offsets = [0, 2, 0], sizes = [2, 1, 8], strides = [1, 1, 1]} : vector<2x8x8xf32> to vector<2x1x8xf32>
    %94 = arith.mulf %92, %93 : vector<2x1x8xf32>
    %c0_37 = arith.constant 0 : index
    %c2 = arith.constant 2 : index
    %c0_38 = arith.constant 0 : index
    %95 = vector.load %arg3[%c0_37, %c2, %c0_38] : memref<2x8x8xf32, #tpu.memory_space<vmem>>, vector<2x1x8xf32>
    tpu.vector_store %arg3[%c0_37, %c2, %c0_38], %94 {strides = array<i32>} : memref<2x8x8xf32, #tpu.memory_space<vmem>>, vector<2x1x8xf32>,
    %96 = vector.extract_strided_slice %74 {offsets = [0, 3, 0], sizes = [2, 1, 8], strides = [1, 1, 1]} : vector<2x8x8xf32> to vector<2x1x8xf32>
    %97 = vector.extract_strided_slice %76 {offsets = [0, 2, 0], sizes = [2, 1, 8], strides = [1, 1, 1]} : vector<2x8x8xf32> to vector<2x1x8xf32>
    %98 = arith.mulf %97, %94 : vector<2x1x8xf32>
    %99 = arith.subf %96, %98 : vector<2x1x8xf32>
    %100 = vector.extract_strided_slice %75 {offsets = [0, 3, 0], sizes = [2, 1, 8], strides = [1, 1, 1]} : vector<2x8x8xf32> to vector<2x1x8xf32>
    %101 = arith.mulf %99, %100 : vector<2x1x8xf32>
    %c0_39 = arith.constant 0 : index
    %c3 = arith.constant 3 : index
    %c0_40 = arith.constant 0 : index
    %102 = vector.load %arg3[%c0_39, %c3, %c0_40] : memref<2x8x8xf32, #tpu.memory_space<vmem>>, vector<2x1x8xf32>
    tpu.vector_store %arg3[%c0_39, %c3, %c0_40], %101 {strides = array<i32>} : memref<2x8x8xf32, #tpu.memory_space<vmem>>, vector<2x1x8xf32>,
    %103 = vector.extract_strided_slice %74 {offsets = [0, 4, 0], sizes = [2, 1, 8], strides = [1, 1, 1]} : vector<2x8x8xf32> to vector<2x1x8xf32>
    %104 = vector.extract_strided_slice %76 {offsets = [0, 3, 0], sizes = [2, 1, 8], strides = [1, 1, 1]} : vector<2x8x8xf32> to vector<2x1x8xf32>
    %105 = arith.mulf %104, %101 : vector<2x1x8xf32>
    %106 = arith.subf %103, %105 : vector<2x1x8xf32>
    %107 = vector.extract_strided_slice %75 {offsets = [0, 4, 0], sizes = [2, 1, 8], strides = [1, 1, 1]} : vector<2x8x8xf32> to vector<2x1x8xf32>
    %108 = arith.mulf %106, %107 : vector<2x1x8xf32>
    %c0_41 = arith.constant 0 : index
    %c4 = arith.constant 4 : index
    %c0_42 = arith.constant 0 : index
    %109 = vector.load %arg3[%c0_41, %c4, %c0_42] : memref<2x8x8xf32, #tpu.memory_space<vmem>>, vector<2x1x8xf32>
    tpu.vector_store %arg3[%c0_41, %c4, %c0_42], %108 {strides = array<i32>} : memref<2x8x8xf32, #tpu.memory_space<vmem>>, vector<2x1x8xf32>,
    %110 = vector.extract_strided_slice %74 {offsets = [0, 5, 0], sizes = [2, 1, 8], strides = [1, 1, 1]} : vector<2x8x8xf32> to vector<2x1x8xf32>
    %111 = vector.extract_strided_slice %76 {offsets = [0, 4, 0], sizes = [2, 1, 8], strides = [1, 1, 1]} : vector<2x8x8xf32> to vector<2x1x8xf32>
    %112 = arith.mulf %111, %108 : vector<2x1x8xf32>
    %113 = arith.subf %110, %112 : vector<2x1x8xf32>
    %114 = vector.extract_strided_slice %75 {offsets = [0, 5, 0], sizes = [2, 1, 8], strides = [1, 1, 1]} : vector<2x8x8xf32> to vector<2x1x8xf32>
    %115 = arith.mulf %113, %114 : vector<2x1x8xf32>
    %c0_43 = arith.constant 0 : index
    %c5 = arith.constant 5 : index
    %c0_44 = arith.constant 0 : index
    %116 = vector.load %arg3[%c0_43, %c5, %c0_44] : memref<2x8x8xf32, #tpu.memory_space<vmem>>, vector<2x1x8xf32>
    tpu.vector_store %arg3[%c0_43, %c5, %c0_44], %115 {strides = array<i32>} : memref<2x8x8xf32, #tpu.memory_space<vmem>>, vector<2x1x8xf32>,
    %117 = vector.extract_strided_slice %74 {offsets = [0, 6, 0], sizes = [2, 1, 8], strides = [1, 1, 1]} : vector<2x8x8xf32> to vector<2x1x8xf32>
    %118 = vector.extract_strided_slice %76 {offsets = [0, 5, 0], sizes = [2, 1, 8], strides = [1, 1, 1]} : vector<2x8x8xf32> to vector<2x1x8xf32>
    %119 = arith.mulf %118, %115 : vector<2x1x8xf32>
    %120 = arith.subf %117, %119 : vector<2x1x8xf32>
    %121 = vector.extract_strided_slice %75 {offsets = [0, 6, 0], sizes = [2, 1, 8], strides = [1, 1, 1]} : vector<2x8x8xf32> to vector<2x1x8xf32>
    %122 = arith.mulf %120, %121 : vector<2x1x8xf32>
    %c0_45 = arith.constant 0 : index
    %c6 = arith.constant 6 : index
    %c0_46 = arith.constant 0 : index
    %123 = vector.load %arg3[%c0_45, %c6, %c0_46] : memref<2x8x8xf32, #tpu.memory_space<vmem>>, vector<2x1x8xf32>
    tpu.vector_store %arg3[%c0_45, %c6, %c0_46], %122 {strides = array<i32>} : memref<2x8x8xf32, #tpu.memory_space<vmem>>, vector<2x1x8xf32>,
    %124 = vector.extract_strided_slice %74 {offsets = [0, 7, 0], sizes = [2, 1, 8], strides = [1, 1, 1]} : vector<2x8x8xf32> to vector<2x1x8xf32>
    %125 = vector.extract_strided_slice %76 {offsets = [0, 6, 0], sizes = [2, 1, 8], strides = [1, 1, 1]} : vector<2x8x8xf32> to vector<2x1x8xf32>
    %126 = arith.mulf %125, %122 : vector<2x1x8xf32>
    %127 = arith.subf %124, %126 : vector<2x1x8xf32>
    %128 = vector.extract_strided_slice %75 {offsets = [0, 7, 0], sizes = [2, 1, 8], strides = [1, 1, 1]} : vector<2x8x8xf32> to vector<2x1x8xf32>
    %129 = arith.mulf %127, %128 : vector<2x1x8xf32>
    %c0_47 = arith.constant 0 : index
    %c7 = arith.constant 7 : index
    %c0_48 = arith.constant 0 : index
    %130 = vector.load %arg3[%c0_47, %c7, %c0_48] : memref<2x8x8xf32, #tpu.memory_space<vmem>>, vector<2x1x8xf32>
    tpu.vector_store %arg3[%c0_47, %c7, %c0_48], %129 {strides = array<i32>} : memref<2x8x8xf32, #tpu.memory_space<vmem>>, vector<2x1x8xf32>,
    %c0_49 = arith.constant 0 : index
    %c0_50 = arith.constant 0 : index
    %c0_51 = arith.constant 0 : index
    %131 = vector.load %arg3[%c0_49, %c0_50, %c0_51] : memref<2x8x8xf32, #tpu.memory_space<vmem>>, vector<2x8x8xf32>
    %132 = vector.shape_cast %131 : vector<2x8x8xf32> to vector<16x8xf32>
    %133 = tpu.iota {dimensions = array<i32: 1>} : vector<2x8x8xi32>
    %cst_52 = arith.constant 0.000000e+00 : f32
    %134 = vector.broadcast %cst_52 : f32 to vector<2x8x8xf32>
    %135 = vector.extract_strided_slice %77 {offsets = [0, 7, 0], sizes = [2, 1, 8], strides = [1, 1, 1]} : vector<2x8x8xf32> to vector<2x1x8xf32>
    %136 = vector.broadcast %135 : vector<2x1x8xf32> to vector<2x8x8xf32>
    %137 = arith.mulf %136, %134 : vector<2x8x8xf32>
    %c7_i32_53 = arith.constant 7 : i32
    %138 = vector.broadcast %c7_i32_53 : i32 to vector<2x8x8xi32>
    %139 = arith.cmpi eq, %133, %138 : vector<2x8x8xi32>
    %140 = vector.extract_strided_slice %75 {offsets = [0, 7, 0], sizes = [2, 1, 8], strides = [1, 1, 1]} : vector<2x8x8xf32> to vector<2x1x8xf32>
    %cst_54 = arith.constant 0.000000e+00 : f32
    %141 = vector.shape_cast %140 : vector<2x1x8xf32> to vector<2x1x8xf32>
    %142 = vector.broadcast %141 : vector<2x1x8xf32> to vector<2x8x8xf32>
    %143 = vector.broadcast %cst_54 : f32 to vector<2x8x8xf32>
    %144 = arith.select %139, %142, %143 : vector<2x8x8xi1>, vector<2x8x8xf32>
    %145 = arith.addf %137, %144 : vector<2x8x8xf32>
    %146 = tpu.weird %145 : vector<2x8x8xf32> -> vector<2x8x8xi1>
    %cst_55 = arith.constant dense<true> : vector<2x8x8xi1>
    %147 = arith.xori %146, %cst_55 : vector<2x8x8xi1>
    %cst_56 = arith.constant 0.000000e+00 : f32
    %148 = vector.broadcast %cst_56 : f32 to vector<2x8x8xf32>
    %149 = arith.select %147, %145, %148 : vector<2x8x8xi1>, vector<2x8x8xf32>
    %150 = vector.shape_cast %149 : vector<2x8x8xf32> to vector<16x8xf32>
    %c0_57 = arith.constant 0 : index
    %c80 = arith.constant 80 : index
    %151 = vector.load %arg2[%c0_57, %c80] : memref<16x128xf32, #tpu.memory_space<vmem>>, vector<16x8xf32>
    tpu.vector_store %arg2[%c0_57, %c80], %150 {strides = array<i32>} : memref<16x128xf32, #tpu.memory_space<vmem>>, vector<16x8xf32>,
    %152 = vector.extract_strided_slice %77 {offsets = [0, 6, 0], sizes = [2, 1, 8], strides = [1, 1, 1]} : vector<2x8x8xf32> to vector<2x1x8xf32>
    %153 = vector.broadcast %152 : vector<2x1x8xf32> to vector<2x8x8xf32>
    %154 = arith.mulf %153, %145 : vector<2x8x8xf32>
    %c6_i32 = arith.constant 6 : i32
    %155 = vector.broadcast %c6_i32 : i32 to vector<2x8x8xi32>
    %156 = arith.cmpi eq, %133, %155 : vector<2x8x8xi32>
    %157 = vector.extract_strided_slice %75 {offsets = [0, 6, 0], sizes = [2, 1, 8], strides = [1, 1, 1]} : vector<2x8x8xf32> to vector<2x1x8xf32>
    %cst_58 = arith.constant 0.000000e+00 : f32
    %158 = vector.shape_cast %157 : vector<2x1x8xf32> to vector<2x1x8xf32>
    %159 = vector.broadcast %158 : vector<2x1x8xf32> to vector<2x8x8xf32>
    %160 = vector.broadcast %cst_58 : f32 to vector<2x8x8xf32>
    %161 = arith.select %156, %159, %160 : vector<2x8x8xi1>, vector<2x8x8xf32>
    %162 = arith.addf %154, %161 : vector<2x8x8xf32>
    %163 = tpu.weird %162 : vector<2x8x8xf32> -> vector<2x8x8xi1>
    %cst_59 = arith.constant dense<true> : vector<2x8x8xi1>
    %164 = arith.xori %163, %cst_59 : vector<2x8x8xi1>
    %cst_60 = arith.constant 0.000000e+00 : f32
    %165 = vector.broadcast %cst_60 : f32 to vector<2x8x8xf32>
    %166 = arith.select %164, %162, %165 : vector<2x8x8xi1>, vector<2x8x8xf32>
    %167 = vector.shape_cast %166 : vector<2x8x8xf32> to vector<16x8xf32>
    %c0_61 = arith.constant 0 : index
    %c72 = arith.constant 72 : index
    %168 = vector.load %arg2[%c0_61, %c72] : memref<16x128xf32, #tpu.memory_space<vmem>>, vector<16x8xf32>
    tpu.vector_store %arg2[%c0_61, %c72], %167 {strides = array<i32>} : memref<16x128xf32, #tpu.memory_space<vmem>>, vector<16x8xf32>,
    %169 = vector.extract_strided_slice %77 {offsets = [0, 5, 0], sizes = [2, 1, 8], strides = [1, 1, 1]} : vector<2x8x8xf32> to vector<2x1x8xf32>
    %170 = vector.broadcast %169 : vector<2x1x8xf32> to vector<2x8x8xf32>
    %171 = arith.mulf %170, %162 : vector<2x8x8xf32>
    %c5_i32 = arith.constant 5 : i32
    %172 = vector.broadcast %c5_i32 : i32 to vector<2x8x8xi32>
    %173 = arith.cmpi eq, %133, %172 : vector<2x8x8xi32>
    %174 = vector.extract_strided_slice %75 {offsets = [0, 5, 0], sizes = [2, 1, 8], strides = [1, 1, 1]} : vector<2x8x8xf32> to vector<2x1x8xf32>
    %cst_62 = arith.constant 0.000000e+00 : f32
    %175 = vector.shape_cast %174 : vector<2x1x8xf32> to vector<2x1x8xf32>
    %176 = vector.broadcast %175 : vector<2x1x8xf32> to vector<2x8x8xf32>
    %177 = vector.broadcast %cst_62 : f32 to vector<2x8x8xf32>
    %178 = arith.select %173, %176, %177 : vector<2x8x8xi1>, vector<2x8x8xf32>
    %179 = arith.addf %171, %178 : vector<2x8x8xf32>
    %180 = tpu.weird %179 : vector<2x8x8xf32> -> vector<2x8x8xi1>
    %cst_63 = arith.constant dense<true> : vector<2x8x8xi1>
    %181 = arith.xori %180, %cst_63 : vector<2x8x8xi1>
    %cst_64 = arith.constant 0.000000e+00 : f32
    %182 = vector.broadcast %cst_64 : f32 to vector<2x8x8xf32>
    %183 = arith.select %181, %179, %182 : vector<2x8x8xi1>, vector<2x8x8xf32>
    %184 = vector.shape_cast %183 : vector<2x8x8xf32> to vector<16x8xf32>
    %c0_65 = arith.constant 0 : index
    %c64 = arith.constant 64 : index
    %185 = vector.load %arg2[%c0_65, %c64] : memref<16x128xf32, #tpu.memory_space<vmem>>, vector<16x8xf32>
    tpu.vector_store %arg2[%c0_65, %c64], %184 {strides = array<i32>} : memref<16x128xf32, #tpu.memory_space<vmem>>, vector<16x8xf32>,
    %186 = vector.extract_strided_slice %77 {offsets = [0, 4, 0], sizes = [2, 1, 8], strides = [1, 1, 1]} : vector<2x8x8xf32> to vector<2x1x8xf32>
    %187 = vector.broadcast %186 : vector<2x1x8xf32> to vector<2x8x8xf32>
    %188 = arith.mulf %187, %179 : vector<2x8x8xf32>
    %c4_i32 = arith.constant 4 : i32
    %189 = vector.broadcast %c4_i32 : i32 to vector<2x8x8xi32>
    %190 = arith.cmpi eq, %133, %189 : vector<2x8x8xi32>
    %191 = vector.extract_strided_slice %75 {offsets = [0, 4, 0], sizes = [2, 1, 8], strides = [1, 1, 1]} : vector<2x8x8xf32> to vector<2x1x8xf32>
    %cst_66 = arith.constant 0.000000e+00 : f32
    %192 = vector.shape_cast %191 : vector<2x1x8xf32> to vector<2x1x8xf32>
    %193 = vector.broadcast %192 : vector<2x1x8xf32> to vector<2x8x8xf32>
    %194 = vector.broadcast %cst_66 : f32 to vector<2x8x8xf32>
    %195 = arith.select %190, %193, %194 : vector<2x8x8xi1>, vector<2x8x8xf32>
    %196 = arith.addf %188, %195 : vector<2x8x8xf32>
    %197 = tpu.weird %196 : vector<2x8x8xf32> -> vector<2x8x8xi1>
    %cst_67 = arith.constant dense<true> : vector<2x8x8xi1>
    %198 = arith.xori %197, %cst_67 : vector<2x8x8xi1>
    %cst_68 = arith.constant 0.000000e+00 : f32
    %199 = vector.broadcast %cst_68 : f32 to vector<2x8x8xf32>
    %200 = arith.select %198, %196, %199 : vector<2x8x8xi1>, vector<2x8x8xf32>
    %201 = vector.shape_cast %200 : vector<2x8x8xf32> to vector<16x8xf32>
    %c0_69 = arith.constant 0 : index
    %c56_70 = arith.constant 56 : index
    %202 = vector.load %arg2[%c0_69, %c56_70] : memref<16x128xf32, #tpu.memory_space<vmem>>, vector<16x8xf32>
    tpu.vector_store %arg2[%c0_69, %c56_70], %201 {strides = array<i32>} : memref<16x128xf32, #tpu.memory_space<vmem>>, vector<16x8xf32>,
    %203 = vector.extract_strided_slice %77 {offsets = [0, 3, 0], sizes = [2, 1, 8], strides = [1, 1, 1]} : vector<2x8x8xf32> to vector<2x1x8xf32>
    %204 = vector.broadcast %203 : vector<2x1x8xf32> to vector<2x8x8xf32>
    %205 = arith.mulf %204, %196 : vector<2x8x8xf32>
    %c3_i32 = arith.constant 3 : i32
    %206 = vector.broadcast %c3_i32 : i32 to vector<2x8x8xi32>
    %207 = arith.cmpi eq, %133, %206 : vector<2x8x8xi32>
    %208 = vector.extract_strided_slice %75 {offsets = [0, 3, 0], sizes = [2, 1, 8], strides = [1, 1, 1]} : vector<2x8x8xf32> to vector<2x1x8xf32>
    %cst_71 = arith.constant 0.000000e+00 : f32
    %209 = vector.shape_cast %208 : vector<2x1x8xf32> to vector<2x1x8xf32>
    %210 = vector.broadcast %209 : vector<2x1x8xf32> to vector<2x8x8xf32>
    %211 = vector.broadcast %cst_71 : f32 to vector<2x8x8xf32>
    %212 = arith.select %207, %210, %211 : vector<2x8x8xi1>, vector<2x8x8xf32>
    %213 = arith.addf %205, %212 : vector<2x8x8xf32>
    %214 = tpu.weird %213 : vector<2x8x8xf32> -> vector<2x8x8xi1>
    %cst_72 = arith.constant dense<true> : vector<2x8x8xi1>
    %215 = arith.xori %214, %cst_72 : vector<2x8x8xi1>
    %cst_73 = arith.constant 0.000000e+00 : f32
    %216 = vector.broadcast %cst_73 : f32 to vector<2x8x8xf32>
    %217 = arith.select %215, %213, %216 : vector<2x8x8xi1>, vector<2x8x8xf32>
    %218 = vector.shape_cast %217 : vector<2x8x8xf32> to vector<16x8xf32>
    %c0_74 = arith.constant 0 : index
    %c48_75 = arith.constant 48 : index
    %219 = vector.load %arg2[%c0_74, %c48_75] : memref<16x128xf32, #tpu.memory_space<vmem>>, vector<16x8xf32>
    tpu.vector_store %arg2[%c0_74, %c48_75], %218 {strides = array<i32>} : memref<16x128xf32, #tpu.memory_space<vmem>>, vector<16x8xf32>,
    %220 = vector.extract_strided_slice %77 {offsets = [0, 2, 0], sizes = [2, 1, 8], strides = [1, 1, 1]} : vector<2x8x8xf32> to vector<2x1x8xf32>
    %221 = vector.broadcast %220 : vector<2x1x8xf32> to vector<2x8x8xf32>
    %222 = arith.mulf %221, %213 : vector<2x8x8xf32>
    %c2_i32 = arith.constant 2 : i32
    %223 = vector.broadcast %c2_i32 : i32 to vector<2x8x8xi32>
    %224 = arith.cmpi eq, %133, %223 : vector<2x8x8xi32>
    %225 = vector.extract_strided_slice %75 {offsets = [0, 2, 0], sizes = [2, 1, 8], strides = [1, 1, 1]} : vector<2x8x8xf32> to vector<2x1x8xf32>
    %cst_76 = arith.constant 0.000000e+00 : f32
    %226 = vector.shape_cast %225 : vector<2x1x8xf32> to vector<2x1x8xf32>
    %227 = vector.broadcast %226 : vector<2x1x8xf32> to vector<2x8x8xf32>
    %228 = vector.broadcast %cst_76 : f32 to vector<2x8x8xf32>
    %229 = arith.select %224, %227, %228 : vector<2x8x8xi1>, vector<2x8x8xf32>
    %230 = arith.addf %222, %229 : vector<2x8x8xf32>
    %231 = tpu.weird %230 : vector<2x8x8xf32> -> vector<2x8x8xi1>
    %cst_77 = arith.constant dense<true> : vector<2x8x8xi1>
    %232 = arith.xori %231, %cst_77 : vector<2x8x8xi1>
    %cst_78 = arith.constant 0.000000e+00 : f32
    %233 = vector.broadcast %cst_78 : f32 to vector<2x8x8xf32>
    %234 = arith.select %232, %230, %233 : vector<2x8x8xi1>, vector<2x8x8xf32>
    %235 = vector.shape_cast %234 : vector<2x8x8xf32> to vector<16x8xf32>
    %c0_79 = arith.constant 0 : index
    %c40 = arith.constant 40 : index
    %236 = vector.load %arg2[%c0_79, %c40] : memref<16x128xf32, #tpu.memory_space<vmem>>, vector<16x8xf32>
    tpu.vector_store %arg2[%c0_79, %c40], %235 {strides = array<i32>} : memref<16x128xf32, #tpu.memory_space<vmem>>, vector<16x8xf32>,
    %237 = vector.extract_strided_slice %77 {offsets = [0, 1, 0], sizes = [2, 1, 8], strides = [1, 1, 1]} : vector<2x8x8xf32> to vector<2x1x8xf32>
    %238 = vector.broadcast %237 : vector<2x1x8xf32> to vector<2x8x8xf32>
    %239 = arith.mulf %238, %230 : vector<2x8x8xf32>
    %c1_i32_80 = arith.constant 1 : i32
    %240 = vector.broadcast %c1_i32_80 : i32 to vector<2x8x8xi32>
    %241 = arith.cmpi eq, %133, %240 : vector<2x8x8xi32>
    %242 = vector.extract_strided_slice %75 {offsets = [0, 1, 0], sizes = [2, 1, 8], strides = [1, 1, 1]} : vector<2x8x8xf32> to vector<2x1x8xf32>
    %cst_81 = arith.constant 0.000000e+00 : f32
    %243 = vector.shape_cast %242 : vector<2x1x8xf32> to vector<2x1x8xf32>
    %244 = vector.broadcast %243 : vector<2x1x8xf32> to vector<2x8x8xf32>
    %245 = vector.broadcast %cst_81 : f32 to vector<2x8x8xf32>
    %246 = arith.select %241, %244, %245 : vector<2x8x8xi1>, vector<2x8x8xf32>
    %247 = arith.addf %239, %246 : vector<2x8x8xf32>
    %248 = tpu.weird %247 : vector<2x8x8xf32> -> vector<2x8x8xi1>
    %cst_82 = arith.constant dense<true> : vector<2x8x8xi1>
    %249 = arith.xori %248, %cst_82 : vector<2x8x8xi1>
    %cst_83 = arith.constant 0.000000e+00 : f32
    %250 = vector.broadcast %cst_83 : f32 to vector<2x8x8xf32>
    %251 = arith.select %249, %247, %250 : vector<2x8x8xi1>, vector<2x8x8xf32>
    %252 = vector.shape_cast %251 : vector<2x8x8xf32> to vector<16x8xf32>
    %c0_84 = arith.constant 0 : index
    %c32_85 = arith.constant 32 : index
    %253 = vector.load %arg2[%c0_84, %c32_85] : memref<16x128xf32, #tpu.memory_space<vmem>>, vector<16x8xf32>
    tpu.vector_store %arg2[%c0_84, %c32_85], %252 {strides = array<i32>} : memref<16x128xf32, #tpu.memory_space<vmem>>, vector<16x8xf32>,
    %254 = vector.extract_strided_slice %77 {offsets = [0, 0, 0], sizes = [2, 1, 8], strides = [1, 1, 1]} : vector<2x8x8xf32> to vector<2x1x8xf32>
    %255 = vector.broadcast %254 : vector<2x1x8xf32> to vector<2x8x8xf32>
    %256 = arith.mulf %255, %247 : vector<2x8x8xf32>
    %c0_i32_86 = arith.constant 0 : i32
    %257 = vector.broadcast %c0_i32_86 : i32 to vector<2x8x8xi32>
    %258 = arith.cmpi eq, %133, %257 : vector<2x8x8xi32>
    %259 = vector.extract_strided_slice %75 {offsets = [0, 0, 0], sizes = [2, 1, 8], strides = [1, 1, 1]} : vector<2x8x8xf32> to vector<2x1x8xf32>
    %cst_87 = arith.constant 0.000000e+00 : f32
    %260 = vector.shape_cast %259 : vector<2x1x8xf32> to vector<2x1x8xf32>
    %261 = vector.broadcast %260 : vector<2x1x8xf32> to vector<2x8x8xf32>
    %262 = vector.broadcast %cst_87 : f32 to vector<2x8x8xf32>
    %263 = arith.select %258, %261, %262 : vector<2x8x8xi1>, vector<2x8x8xf32>
    %264 = arith.addf %256, %263 : vector<2x8x8xf32>
    %265 = tpu.weird %264 : vector<2x8x8xf32> -> vector<2x8x8xi1>
    %cst_88 = arith.constant dense<true> : vector<2x8x8xi1>
    %266 = arith.xori %265, %cst_88 : vector<2x8x8xi1>
    %cst_89 = arith.constant 0.000000e+00 : f32
    %267 = vector.broadcast %cst_89 : f32 to vector<2x8x8xf32>
    %268 = arith.select %266, %264, %267 : vector<2x8x8xi1>, vector<2x8x8xf32>
    %269 = vector.shape_cast %268 : vector<2x8x8xf32> to vector<16x8xf32>
    %c0_90 = arith.constant 0 : index
    %c24 = arith.constant 24 : index
    %270 = vector.load %arg2[%c0_90, %c24] : memref<16x128xf32, #tpu.memory_space<vmem>>, vector<16x8xf32>
    tpu.vector_store %arg2[%c0_90, %c24], %269 {strides = array<i32>} : memref<16x128xf32, #tpu.memory_space<vmem>>, vector<16x8xf32>,
    %271 = arith.addf %50, %132 : vector<16x8xf32>
    %272 = tpu.concatenate %271, %50 in 0 : vector<16x8xf32>, vector<16x8xf32> -> vector<32x8xf32>
    %c136 = arith.constant 136 : index
    %c0_91 = arith.constant 0 : index
    %273 = vector.load %arg1[%c136, %c0_91] : memref<232x128xf32, #tpu.memory_space<vmem>>, vector<8x32xf32>
    %cst_92 = arith.constant dense<0.000000e+00> : vector<32x32xf32>
    %274 = tpu.matmul %272, %273, %cst_92 {dimension_numbers = #tpu.dot_dimension_numbers<[1], [0], [0], [1], [0, 0, 1, 1], [], []>} : vector<32x8xf32>, vector<8x32xf32>, vector<32x32xf32> -> vector<32x32xf32>
    %c144 = arith.constant 144 : index
    %c0_93 = arith.constant 0 : index
    %275 = vector.load %arg1[%c144, %c0_93] : memref<232x128xf32, #tpu.memory_space<vmem>>, vector<1x32xf32>
    %276 = vector.broadcast %275 : vector<1x32xf32> to vector<32x32xf32>
    %277 = arith.addf %274, %276 : vector<32x32xf32>
    %cst_94 = arith.constant 0.000000e+00 : f32
    %278 = vector.broadcast %cst_94 : f32 to vector<32x32xf32>
    %279 = arith.maximumf %277, %278 : vector<32x32xf32>
    %c152 = arith.constant 152 : index
    %c0_95 = arith.constant 0 : index
    %280 = vector.load %arg1[%c152, %c0_95] : memref<232x128xf32, #tpu.memory_space<vmem>>, vector<32x32xf32>
    %cst_96 = arith.constant dense<0.000000e+00> : vector<32x32xf32>
    %281 = tpu.matmul %279, %280, %cst_96 {dimension_numbers = #tpu.dot_dimension_numbers<[1], [0], [0], [1], [0, 0, 1, 1], [], []>} : vector<32x32xf32>, vector<32x32xf32>, vector<32x32xf32> -> vector<32x32xf32>
    %c184 = arith.constant 184 : index
    %c0_97 = arith.constant 0 : index
    %282 = vector.load %arg1[%c184, %c0_97] : memref<232x128xf32, #tpu.memory_space<vmem>>, vector<1x32xf32>
    %283 = vector.broadcast %282 : vector<1x32xf32> to vector<32x32xf32>
    %284 = arith.addf %281, %283 : vector<32x32xf32>
    %cst_98 = arith.constant 0.000000e+00 : f32
    %285 = vector.broadcast %cst_98 : f32 to vector<32x32xf32>
    %286 = arith.maximumf %284, %285 : vector<32x32xf32>
    %c192 = arith.constant 192 : index
    %c0_99 = arith.constant 0 : index
    %287 = vector.load %arg1[%c192, %c0_99] : memref<232x128xf32, #tpu.memory_space<vmem>>, vector<32x16xf32>
    %cst_100 = arith.constant dense<0.000000e+00> : vector<32x16xf32>
    %288 = tpu.matmul %286, %287, %cst_100 {dimension_numbers = #tpu.dot_dimension_numbers<[1], [0], [0], [1], [0, 0, 1, 1], [], []>} : vector<32x32xf32>, vector<32x16xf32>, vector<32x16xf32> -> vector<32x16xf32>
    %c224 = arith.constant 224 : index
    %c0_101 = arith.constant 0 : index
    %289 = vector.load %arg1[%c224, %c0_101] : memref<232x128xf32, #tpu.memory_space<vmem>>, vector<1x16xf32>
    %290 = vector.broadcast %289 : vector<1x16xf32> to vector<32x16xf32>
    %291 = arith.addf %288, %290 : vector<32x16xf32>
    %292 = vector.extract_strided_slice %291 {offsets = [0, 0], sizes = [16, 16], strides = [1, 1]} : vector<32x16xf32> to vector<16x16xf32>
    %293 = vector.extract_strided_slice %291 {offsets = [16, 0], sizes = [16, 16], strides = [1, 1]} : vector<32x16xf32> to vector<16x16xf32>
    %294 = arith.subf %0, %292 : vector<16x16xf32>
    %295 = arith.mulf %294, %294 : vector<16x16xf32>
    %cst_102 = arith.constant 5.000000e-01 : f32
    %296 = vector.broadcast %cst_102 : f32 to vector<16x16xf32>
    %297 = arith.mulf %296, %295 : vector<16x16xf32>
    %cst_103 = arith.constant 6.28318548 : f32
    %298 = math.log %cst_103 : f32
    %cst_104 = arith.constant 5.000000e-01 : f32
    %299 = arith.mulf %cst_104, %298 : f32
    %300 = vector.broadcast %299 : f32 to vector<16x16xf32>
    %301 = arith.addf %297, %300 : vector<16x16xf32>
    %302 = tpu.weird %301 : vector<16x16xf32> -> vector<16x16xi1>
    %cst_105 = arith.constant dense<true> : vector<16x16xi1>
    %303 = arith.xori %302, %cst_105 : vector<16x16xi1>
    %cst_106 = arith.constant 0.000000e+00 : f32
    %304 = vector.broadcast %cst_106 : f32 to vector<16x16xf32>
    %305 = arith.select %303, %301, %304 : vector<16x16xi1>, vector<16x16xf32>
    %cst_107 = arith.constant 5.000000e-01 : f32
    %306 = vector.broadcast %cst_107 : f32 to vector<16x16xf32>
    %307 = arith.cmpf ogt, %1, %306 : vector<16x16xf32>
    %cst_108 = arith.constant 0.000000e+00 : f32
    %308 = vector.broadcast %cst_108 : f32 to vector<16x16xf32>
    %309 = arith.select %307, %305, %308 : vector<16x16xi1>, vector<16x16xf32>
    %cst_109 = arith.constant dense<0.000000e+00> : vector<16xf32>
    %310 = vector.multi_reduction <add>, %309, %cst_109 [1] : vector<16x16xf32> to vector<16xf32>
    %311 = vector.shape_cast %310 : vector<16xf32> to vector<16x1xf32>
    %c0_110 = arith.constant 0 : index
    %c88_111 = arith.constant 88 : index
    %312 = vector.load %arg2[%c0_110, %c88_111] : memref<16x128xf32, #tpu.memory_space<vmem>>, vector<16x1xf32>
    tpu.vector_store %arg2[%c0_110, %c88_111], %311 {strides = array<i32>} : memref<16x128xf32, #tpu.memory_space<vmem>>, vector<16x1xf32>,
    %c0_112 = arith.constant 0 : index
    %c16_113 = arith.constant 16 : index
    %313 = vector.load %arg2[%c0_112, %c16_113] : memref<16x128xf32, #tpu.memory_space<vmem>>, vector<16x8xf32>
    tpu.vector_store %arg2[%c0_112, %c16_113], %50 {strides = array<i32>} : memref<16x128xf32, #tpu.memory_space<vmem>>, vector<16x8xf32>,
    %cst_114 = arith.constant 1.000000e+00 : f32
    %314 = vector.broadcast %cst_114 : f32 to vector<16x16xf32>
    %315 = arith.subf %314, %1 : vector<16x16xf32>
    %316 = arith.mulf %293, %315 : vector<16x16xf32>
    %317 = arith.mulf %0, %1 : vector<16x16xf32>
    %318 = arith.addf %316, %317 : vector<16x16xf32>
    %c0_115 = arith.constant 0 : index
    %c0_116 = arith.constant 0 : index
    %319 = vector.load %arg2[%c0_115, %c0_116] : memref<16x128xf32, #tpu.memory_space<vmem>>, vector<16x16xf32>
    tpu.vector_store %arg2[%c0_115, %c0_116], %318 {strides = array<i32>} : memref<16x128xf32, #tpu.memory_space<vmem>>, vector<16x16xf32>,
    return
  }
}

</mosaic_0001>

<bundles_post_ra>
// kernel: squeeze.6
= control target key start
LH: loop header
LB: loop body
LE: loop exit
PB: predicated region body
PF: predicated region fallthrough
CT: control target
= control target key end

     0   :  { %vm7_vm0 = vcmask 64512   ;;  %s39_s0 = inlined_call_operand.vmem [shape: f32[16], index: 0, kind: input, shape index: {}]   ;;  %s40_s1 = inlined_call_operand.vmem [shape: f32[2,8], index: 1, kind: output, shape index: {}]  }
   0x1   :  { %v4_v0 = vld [vmem:[%s39_s0] sm:$0x1]  ;;  %s22_s0 = smov 120  }
   0x2   :  { %5 = vst [vmem:[#allocation1] sm:$0x1] %v4_v0 }
   0x9   :  { %v9_v1 = vld [vmem:[#allocation1] sm:$0x1]  }
   0xa   :  { %v6_v2 = vld [vmem:[#allocation1] sm:$0x1]   ;;  %10 = vrot.lane.b32.xlu0 %v9_v1, %s22_s0 }
   0xb   :  { %8 = vst.msk [vmem:[#allocation0] sm:$0x1] %vm7_vm0, %v6_v2  }
  0x7c   :  { %v11_v3 = vpop.permute.xlu0 %10  }
  0x7d   :  { %14 = vst.msk [vmem:[#allocation0 + $0x1] sm:$0x1] %vm7_vm0, %v11_v3  }
  0x84   :  { %v17_v4 = vld [vmem:[#allocation0] sm:$0x3] }
  0x85   :  { %20 = vst [vmem:[%s40_s1] sm:$0x3] %v17_v4 }

// kernel: custom-call.4
= control target key start
LH: loop header
LB: loop body
LE: loop exit
PB: predicated region body
PF: predicated region fallthrough
CT: control target
= control target key end

     0   :  { %s543_s6 = smov 0   ;;  %s545_s7 = smov 0   ;;  %s623_s0 = inlined_call_operand.vmem [shape: f32[8,8,8], index: 0, kind: input, shape index: {}]   ;;  %s624_s1 = inlined_call_operand.vmem [shape: f32[8,8,8], index: 1, kind: output, shape index: {}]  }
   0x1   :  { %s547_s8 = smov 0  }
   0x2 LB: > { %s441_s9 = sadd.s32 4294967295, %s530_s8   ;;  %s26_s10 = sadd.s32 1, %s526_s7  ;;  %s530_s8 = sphi %s547_s8, %s7_s8   ;;  %s526_s7 = sphi %s545_s7, %s626_s7   ;;  %s522_s6 = sphi %s543_s6, %s625_s6  }
   0x3   : > { %p28_p0 = scmp.ge.s32.totalorder %s26_s10, 8  ;;  %p443_p1 = scmp.ge.s32.totalorder %s530_s8, 8 }
   0x4   : > { %s42_s11 = sand.u32 (!%p443_p1), 1, %s530_s8   ;;  %s445_s12 = sshll.u32 (!%p443_p1), %s526_s7, 3 }
   0x5   : > { %s628_s10 = smov (%p28_p0, %s26_s10), 0  ;;  %40 = sbr.rel (%p443_p1) target bundleno = 12 (0xc), region = 16 }
   0x6   : > { %s444_s13 = sshll.u32 (!%p443_p1), %s42_s11, 3  ;;  %s48_s16 = scalar_lea.vmem (!%p443_p1), %s623_s0, %s445_s12 }
   0x7   : > { %s44_s17 = scalar_lea.vmem (!%p443_p1), [#allocation0], %s444_s13 }
   0xa   : > { %v77_v0 = vld [vmem:[%s48_s16] sm:$0xff] }
   0xb   : > { %78 = vst [vmem:[%s44_s17] sm:$0xff] %v77_v0 }
   0xc PF: > { %p446_p2 = scmp.ge.s32.totalorder %s530_s8, 1  ;;  %p83_p3 = scmp.lt.s32.totalorder %s530_s8, 9 }
   0xe   : > { %p84_p4 = pnand %p446_p2, %p83_p3 }
   0xf   : > { %s90_s18 = sand.u32 (!%p84_p4), 1, %s441_s9   ;;  %s464_s22 = sshll.u32 (!%p84_p4), %s522_s6, 3 }
  0x10   : > { %87 = sbr.rel (%p84_p4) target bundleno = 1230 (0x4ce), region = 54  ;;  %s447_s19 = sshll.u32 (!%p84_p4), %s90_s18, 3 }
  0x11   : > { %s570_s20 = scalar_lea.vmem (!%p84_p4), [#allocation1], %s447_s19  ;;  %s574_s21 = scalar_lea.vmem (!%p84_p4), [#allocation0], %s447_s19 }
  0x12   : > { %s353_s25 = scalar_lea.vmem (!%p84_p4), %s624_s1, %s464_s22 }
  0x15   : > { %v532_v1 = vmov 0.0   ;;  %v104_v5 = vld [vmem:[%s574_s21] ss:$0 sm:$0xff]  ;;  %vm102_vm3 = vcmask 7168   ;;  %v450_v23 = vld [vmem:[%s574_s21 + $0x1] ss:$0 sm:$0xff] }
  0x16   : > { %101 = vst [vmem:[%s570_s20] sm:$0xff] %v532_v1  ;;  %v578_v13 = vld [vmem:[%s574_s21] sm:$0xff]  ;;  %vm129_vm5 = vcmask 15368   ;;  %vm155_vm6 = vcmask 1047553   ;;  %vm160_vm11 = vcmask 23568   ;;  %vm186_vm12 = vcmask 1047554  }
  0x17   : > { %vm156_vm9 = vmand %vm129_vm5, %vm155_vm6  ;;  %v452_v41 = vld [vmem:[%s574_s21 + $0x2] ss:$0 sm:$0xff]  ;;  %v454_v59 = vld [vmem:[%s574_s21 + $0x3] ss:$0 sm:$0xff] }
  0x18   : > { %vm187_vm15 = vmand %vm160_vm11, %vm186_vm12 }
  0x1d   : > { %v103_v2 = vld [vmem:[%s570_s20] ss:$0 sm:$0xff] }
  0x1e   : > { %v105_v3 = vmul.f32 %v103_v2, %v103_v2  ;;  %v121_v4 = vmul.f32 0.0, %v103_v2 }
  0x20   : > { %106 = vadd.xlane.f32.xlu0 %v105_v3 }
  0x28   : > { %122 = vadd.xlane.f32.xlu0 %v121_v4 }
  0x93   : > { %v107_v6 = vpop.xlane.xlu0 %106 }
  0x94   : > { %v108_v7 = vsub.f32 %v104_v5, %v107_v6 }
  0x96   : > { %492 = vrsqrt.f32 %v108_v7  ;;  %vm115_vm1 = vweird.f32 %v108_v7 }
  0x9b   : > { %v123_v12 = vpop.xlane.xlu0 %122 }
  0x9c   : > { %v493_v8 = vpop.eup %492  ;;  %v124_v15 = vsub.f32 %v578_v13, %v123_v12 }
  0x9d   : > { %v110_v9 = vmul.f32 %v493_v8, %v108_v7  ;;  %vm116_vm0 = vweird.f32 %v493_v8 }
  0x9e   : > { %vm117_vm2 = vmor %vm115_vm1, %vm116_vm0  ;;  %vm191_vm1 = vcmask 31768  }
  0x9f   : > { %v111_v10 = vmul.f32 %v493_v8, %v110_v9 }
  0xa1   : > { %v112_v11 = vmul.f32 0.5, %v111_v10 }
  0xa3   : > { %v113_v14 = vsub.f32 1.5, %v112_v11 }
  0xa5   : > { %v114_v16 = vmul.f32 %v493_v8, %v113_v14  ;;  %v456_v14 = vld [vmem:[%s574_s21 + $0x4] ss:$0 sm:$0xff] }
  0xa7   : > { %v118_v17 = vsel %vm117_vm2, %v493_v8, %v114_v16  ;;  %vm217_vm2 = vcmask 1047555  }
  0xa8   : > { %v125_v18 = vmul.f32 %v124_v15, %v118_v17  ;;  %vm218_vm5 = vmand %vm191_vm1, %vm217_vm2 }
  0xaa   : > { %v126_v19 = vsel %vm102_vm3, %v125_v18, 0.0 }
  0xab   : > { %128 = vst [vmem:[%s570_s20] sm:$0xff] %v126_v19 }
  0xb2   : > { %v449_v20 = vld [vmem:[%s570_s20 + $0x1] ss:$0 sm:$0xff] }
  0xb3   : > { %v134_v21 = vmul.f32 %v449_v20, %v449_v20  ;;  %v150_v22 = vmul.f32 %v449_v20, %v126_v19 }
  0xb5   : > { %135 = vadd.xlane.f32.xlu1 %v134_v21 }
  0xbd   : > { %151 = vadd.xlane.f32.xlu1 %v150_v22 }
 0x128   : > { %v136_v24 = vpop.xlane.xlu1 %135 }
 0x129   : > { %v137_v25 = vsub.f32 %v450_v23, %v136_v24 }
 0x12b   : > { %494 = vrsqrt.f32 %v137_v25  ;;  %vm144_vm7 = vweird.f32 %v137_v25 }
 0x130   : > { %v152_v31 = vpop.xlane.xlu1 %151 }
 0x131   : > { %v495_v26 = vpop.eup %494  ;;  %v153_v33 = vsub.f32 %v578_v13, %v152_v31 }
 0x132   : > { %v139_v27 = vmul.f32 %v495_v26, %v137_v25  ;;  %vm145_vm4 = vweird.f32 %v495_v26 }
 0x133   : > { %vm146_vm8 = vmor %vm144_vm7, %vm145_vm4  ;;  %vm222_vm7 = vcmask 39968  }
 0x134   : > { %v140_v28 = vmul.f32 %v495_v26, %v139_v27 }
 0x136   : > { %v141_v29 = vmul.f32 0.5, %v140_v28 }
 0x138   : > { %v142_v30 = vsub.f32 1.5, %v141_v29 }
 0x13a   : > { %v143_v32 = vmul.f32 %v495_v26, %v142_v30 }
 0x13c   : > { %v147_v34 = vsel %vm146_vm8, %v495_v26, %v143_v32  ;;  %vm248_vm8 = vcmask 1047556   ;;  %v458_v32 = vld [vmem:[%s574_s21 + $0x5] ss:$0 sm:$0xff] }
 0x13d   : > { %v154_v35 = vmul.f32 %v153_v33, %v147_v34  ;;  %vm249_vm11 = vmand %vm222_vm7, %vm248_vm8 }
 0x13f   : > { %v157_v36 = vsel %vm156_vm9, %v154_v35, 0.0 }
 0x140   : > { %v158_v37 = vadd.f32 %v157_v36, %v126_v19 }
 0x142   : > { %159 = vst [vmem:[%s570_s20] sm:$0xff] %v158_v37 }
 0x149   : > { %v451_v38 = vld [vmem:[%s570_s20 + $0x2] ss:$0 sm:$0xff] }
 0x14a   : > { %v165_v39 = vmul.f32 %v451_v38, %v451_v38  ;;  %v181_v40 = vmul.f32 %v451_v38, %v158_v37 }
 0x14c   : > { %166 = vadd.xlane.f32.xlu2 %v165_v39 }
 0x154   : > { %182 = vadd.xlane.f32.xlu2 %v181_v40 }
 0x1bf   : > { %v167_v42 = vpop.xlane.xlu2 %166 }
 0x1c0   : > { %v168_v43 = vsub.f32 %v452_v41, %v167_v42 }
 0x1c2   : > { %496 = vrsqrt.f32 %v168_v43  ;;  %vm175_vm13 = vweird.f32 %v168_v43 }
 0x1c7   : > { %v183_v49 = vpop.xlane.xlu2 %182 }
 0x1c8   : > { %v497_v44 = vpop.eup %496  ;;  %v184_v51 = vsub.f32 %v578_v13, %v183_v49 }
 0x1c9   : > { %v170_v45 = vmul.f32 %v497_v44, %v168_v43  ;;  %vm176_vm10 = vweird.f32 %v497_v44 }
 0x1ca   : > { %vm177_vm14 = vmor %vm175_vm13, %vm176_vm10  ;;  %vm253_vm13 = vcmask 48168  }
 0x1cb   : > { %v171_v46 = vmul.f32 %v497_v44, %v170_v45 }
 0x1cd   : > { %v172_v47 = vmul.f32 0.5, %v171_v46 }
 0x1cf   : > { %v173_v48 = vsub.f32 1.5, %v172_v47 }
 0x1d1   : > { %v174_v50 = vmul.f32 %v497_v44, %v173_v48 }
 0x1d3   : > { %v178_v52 = vsel %vm177_vm14, %v497_v44, %v174_v50  ;;  %vm279_vm14 = vcmask 1047557   ;;  %v460_v50 = vld [vmem:[%s574_s21 + $0x6] ss:$0 sm:$0xff] }
 0x1d4   : > { %v185_v53 = vmul.f32 %v184_v51, %v178_v52  ;;  %vm280_vm1 = vmand %vm253_vm13, %vm279_vm14 }
 0x1d6   : > { %v188_v54 = vsel %vm187_vm15, %v185_v53, 0.0 }
 0x1d7   : > { %v189_v55 = vadd.f32 %v188_v54, %v158_v37 }
 0x1d9   : > { %190 = vst [vmem:[%s570_s20] sm:$0xff] %v189_v55 }
 0x1e0   : > { %v453_v56 = vld [vmem:[%s570_s20 + $0x3] ss:$0 sm:$0xff] }
 0x1e1   : > { %v212_v57 = vmul.f32 %v453_v56, %v189_v55  ;;  %v196_v58 = vmul.f32 %v453_v56, %v453_v56 }
 0x1e3   : > { %213 = vadd.xlane.f32.xlu1 %v212_v57  ;;  %197 = vadd.xlane.f32.xlu0 %v196_v58 }
 0x256   : > { %v198_v60 = vpop.xlane.xlu0 %197  ;;  %v214_v2 = vpop.xlane.xlu1 %213 }
 0x257   : > { %v199_v61 = vsub.f32 %v454_v59, %v198_v60  ;;  %v215_v5 = vsub.f32 %v578_v13, %v214_v2 }
 0x259   : > { %498 = vrsqrt.f32 %v199_v61  ;;  %vm206_vm3 = vweird.f32 %v199_v61 }
 0x25f   : > { %v499_v62 = vpop.eup %498 }
 0x260   : > { %v201_v63 = vmul.f32 %v499_v62, %v199_v61  ;;  %vm207_vm0 = vweird.f32 %v499_v62 }
 0x261   : > { %vm208_vm4 = vmor %vm206_vm3, %vm207_vm0  ;;  %vm284_vm3 = vcmask 56368  }
 0x262   : > { %v202_v0 = vmul.f32 %v499_v62, %v201_v63 }
 0x264   : > { %v203_v1 = vmul.f32 0.5, %v202_v0 }
 0x266   : > { %v204_v3 = vsub.f32 1.5, %v203_v1 }
 0x268   : > { %v205_v4 = vmul.f32 %v499_v62, %v204_v3 }
 0x26a   : > { %v209_v6 = vsel %vm208_vm4, %v499_v62, %v205_v4  ;;  %vm310_vm4 = vcmask 1047558   ;;  %v462_v4 = vld [vmem:[%s574_s21 + $0x7] ss:$0 sm:$0xff] }
 0x26b   : > { %v216_v7 = vmul.f32 %v215_v5, %v209_v6  ;;  %vm311_vm7 = vmand %vm284_vm3, %vm310_vm4 }
 0x26d   : > { %v219_v8 = vsel %vm218_vm5, %v216_v7, 0.0 }
 0x26e   : > { %v220_v9 = vadd.f32 %v219_v8, %v189_v55 }
 0x270   : > { %221 = vst [vmem:[%s570_s20] sm:$0xff] %v220_v9 }
 0x277   : > { %v455_v10 = vld [vmem:[%s570_s20 + $0x4] ss:$0 sm:$0xff] }
 0x278   : > { %v243_v11 = vmul.f32 %v455_v10, %v220_v9  ;;  %v227_v12 = vmul.f32 %v455_v10, %v455_v10 }
 0x27a   : > { %244 = vadd.xlane.f32.xlu0 %v243_v11  ;;  %228 = vadd.xlane.f32.xlu2 %v227_v12 }
 0x2ed   : > { %v229_v15 = vpop.xlane.xlu2 %228  ;;  %v245_v21 = vpop.xlane.xlu0 %244 }
 0x2ee   : > { %v230_v16 = vsub.f32 %v456_v14, %v229_v15  ;;  %v246_v24 = vsub.f32 %v578_v13, %v245_v21 }
 0x2f0   : > { %500 = vrsqrt.f32 %v230_v16  ;;  %vm237_vm9 = vweird.f32 %v230_v16 }
 0x2f6   : > { %v501_v17 = vpop.eup %500 }
 0x2f7   : > { %v232_v18 = vmul.f32 %v501_v17, %v230_v16  ;;  %vm238_vm6 = vweird.f32 %v501_v17 }
 0x2f8   : > { %vm239_vm10 = vmor %vm237_vm9, %vm238_vm6  ;;  %vm315_vm9 = vcmask 64568  }
 0x2f9   : > { %v233_v19 = vmul.f32 %v501_v17, %v232_v18 }
 0x2fb   : > { %v234_v20 = vmul.f32 0.5, %v233_v19 }
 0x2fd   : > { %v235_v22 = vsub.f32 1.5, %v234_v20 }
 0x2ff   : > { %v236_v23 = vmul.f32 %v501_v17, %v235_v22 }
 0x301   : > { %v240_v25 = vsel %vm239_vm10, %v501_v17, %v236_v23  ;;  %vm341_vm10 = vcmask 1047559  }
 0x302   : > { %v247_v26 = vmul.f32 %v246_v24, %v240_v25  ;;  %vm342_vm13 = vmand %vm315_vm9, %vm341_vm10 }
 0x304   : > { %v250_v27 = vsel %vm249_vm11, %v247_v26, 0.0 }
 0x305   : > { %v251_v28 = vadd.f32 %v250_v27, %v220_v9 }
 0x307   : > { %252 = vst [vmem:[%s570_s20] sm:$0xff] %v251_v28 }
 0x30e   : > { %v457_v29 = vld [vmem:[%s570_s20 + $0x5] ss:$0 sm:$0xff] }
 0x30f   : > { %v274_v30 = vmul.f32 %v457_v29, %v251_v28  ;;  %v258_v31 = vmul.f32 %v457_v29, %v457_v29 }
 0x311   : > { %275 = vadd.xlane.f32.xlu2 %v274_v30  ;;  %259 = vadd.xlane.f32.xlu1 %v258_v31 }
 0x384   : > { %v260_v33 = vpop.xlane.xlu1 %259  ;;  %v276_v39 = vpop.xlane.xlu2 %275 }
 0x385   : > { %v261_v34 = vsub.f32 %v458_v32, %v260_v33  ;;  %v277_v42 = vsub.f32 %v578_v13, %v276_v39 }
 0x387   : > { %502 = vrsqrt.f32 %v261_v34  ;;  %vm268_vm15 = vweird.f32 %v261_v34 }
 0x38d   : > { %v503_v35 = vpop.eup %502 }
 0x38e   : > { %v263_v36 = vmul.f32 %v503_v35, %v261_v34  ;;  %vm269_vm12 = vweird.f32 %v503_v35 }
 0x38f   : > { %vm270_vm0 = vmor %vm268_vm15, %vm269_vm12 }
 0x390   : > { %v264_v37 = vmul.f32 %v503_v35, %v263_v36 }
 0x392   : > { %v265_v38 = vmul.f32 0.5, %v264_v37 }
 0x394   : > { %v266_v40 = vsub.f32 1.5, %v265_v38 }
 0x396   : > { %v267_v41 = vmul.f32 %v503_v35, %v266_v40 }
 0x398   : > { %v271_v43 = vsel %vm270_vm0, %v503_v35, %v267_v41 }
 0x399   : > { %v278_v44 = vmul.f32 %v277_v42, %v271_v43 }
 0x39b   : > { %v281_v45 = vsel %vm280_vm1, %v278_v44, 0.0 }
 0x39c   : > { %v282_v46 = vadd.f32 %v281_v45, %v251_v28 }
 0x39e   : > { %283 = vst [vmem:[%s570_s20] sm:$0xff] %v282_v46 }
 0x3a5   : > { %v459_v47 = vld [vmem:[%s570_s20 + $0x6] ss:$0 sm:$0xff] }
 0x3a6   : > { %v305_v48 = vmul.f32 %v459_v47, %v282_v46  ;;  %v289_v49 = vmul.f32 %v459_v47, %v459_v47 }
 0x3a8   : > { %306 = vadd.xlane.f32.xlu1 %v305_v48  ;;  %290 = vadd.xlane.f32.xlu0 %v289_v49 }
 0x41b   : > { %v291_v51 = vpop.xlane.xlu0 %290  ;;  %v307_v57 = vpop.xlane.xlu1 %306 }
 0x41c   : > { %v292_v52 = vsub.f32 %v460_v50, %v291_v51  ;;  %v308_v60 = vsub.f32 %v578_v13, %v307_v57 }
 0x41e   : > { %504 = vrsqrt.f32 %v292_v52  ;;  %vm299_vm5 = vweird.f32 %v292_v52 }
 0x424   : > { %v505_v53 = vpop.eup %504 }
 0x425   : > { %v294_v54 = vmul.f32 %v505_v53, %v292_v52  ;;  %vm300_vm2 = vweird.f32 %v505_v53 }
 0x426   : > { %vm301_vm6 = vmor %vm299_vm5, %vm300_vm2 }
 0x427   : > { %v295_v55 = vmul.f32 %v505_v53, %v294_v54 }
 0x429   : > { %v296_v56 = vmul.f32 0.5, %v295_v55 }
 0x42b   : > { %v297_v58 = vsub.f32 1.5, %v296_v56 }
 0x42d   : > { %v298_v59 = vmul.f32 %v505_v53, %v297_v58 }
 0x42f   : > { %v302_v61 = vsel %vm301_vm6, %v505_v53, %v298_v59 }
 0x430   : > { %v309_v62 = vmul.f32 %v308_v60, %v302_v61 }
 0x432   : > { %v312_v63 = vsel %vm311_vm7, %v309_v62, 0.0 }
 0x433   : > { %v313_v0 = vadd.f32 %v312_v63, %v282_v46 }
 0x435   : > { %314 = vst [vmem:[%s570_s20] sm:$0xff] %v313_v0 }
 0x43c   : > { %v461_v1 = vld [vmem:[%s570_s20 + $0x7] ss:$0 sm:$0xff] }
 0x43d   : > { %v336_v2 = vmul.f32 %v461_v1, %v313_v0  ;;  %v320_v3 = vmul.f32 %v461_v1, %v461_v1 }
 0x43f   : > { %337 = vadd.xlane.f32.xlu0 %v336_v2  ;;  %321 = vadd.xlane.f32.xlu2 %v320_v3 }
 0x4b2   : > { %v322_v5 = vpop.xlane.xlu2 %321  ;;  %v338_v11 = vpop.xlane.xlu0 %337 }
 0x4b3   : > { %v323_v6 = vsub.f32 %v462_v4, %v322_v5  ;;  %v339_v15 = vsub.f32 %v578_v13, %v338_v11 }
 0x4b5   : > { %506 = vrsqrt.f32 %v323_v6  ;;  %vm330_vm11 = vweird.f32 %v323_v6 }
 0x4bb   : > { %v507_v7 = vpop.eup %506 }
 0x4bc   : > { %v325_v8 = vmul.f32 %v507_v7, %v323_v6  ;;  %vm331_vm8 = vweird.f32 %v507_v7 }
 0x4bd   : > { %vm332_vm12 = vmor %vm330_vm11, %vm331_vm8 }
 0x4be   : > { %v326_v9 = vmul.f32 %v507_v7, %v325_v8 }
 0x4c0   : > { %v327_v10 = vmul.f32 0.5, %v326_v9 }
 0x4c2   : > { %v328_v12 = vsub.f32 1.5, %v327_v10 }
 0x4c4   : > { %v329_v14 = vmul.f32 %v507_v7, %v328_v12 }
 0x4c6   : > { %v333_v16 = vsel %vm332_vm12, %v507_v7, %v329_v14 }
 0x4c7   : > { %v340_v17 = vmul.f32 %v339_v15, %v333_v16 }
 0x4c9   : > { %v343_v18 = vsel %vm342_vm13, %v340_v17, 0.0 }
 0x4ca   : > { %v344_v19 = vadd.f32 %v343_v18, %v313_v0 }
 0x4cc   : > { %345 = vst [vmem:[%s570_s20] sm:$0xff] %v344_v19 }
 0x4cd   : > { %383 = vst [vmem:[%s353_s25] sm:$0xff] %v344_v19 }
 0x4ce PF: > { %s7_s8 = sadd.s32 1, %s530_s8   ;;  %s625_s6 = smov %s526_s7 }
 0x4cf   : > { %p4_p5 = scmp.ge.s32.totalorder %s7_s8, 10   ;;  %s626_s7 = smov %s628_s10 }
 0x4d1   :  { %6 = sbr.rel (!%p4_p5) target bundleno = 2 (0x2), region = 132 }

// kernel: custom-call.5
= control target key start
LH: loop header
LB: loop body
LE: loop exit
PB: predicated region body
PF: predicated region fallthrough
CT: control target
= control target key end

     0   :  { %s468_s6 = smov 0   ;;  %s470_s7 = smov 0   ;;  %s555_s0 = inlined_call_operand.vmem [shape: f32[2,8,1,8,8], index: 0, kind: input, shape index: {}]   ;;  %s556_s1 = inlined_call_operand.vmem [shape: f32[2,8,1,8,8], index: 1, kind: output, shape index: {}]  }
   0x1   :  { %s472_s8 = smov 0   ;;  %s474_s9 = smov 0  }
   0x2   :  { %s476_s10 = smov 0  }
   0x3 LB: > { %s360_s11 = sadd.s32 4294967295, %s455_s10   ;;  %s36_s12 = sadd.s32 1, %s447_s8  ;;  %s455_s10 = sphi %s476_s10, %s7_s10   ;;  %s451_s9 = sphi %s474_s9, %s560_s9   ;;  %s447_s8 = sphi %s472_s8, %s559_s8   ;;  %s443_s7 = sphi %s470_s7, %s558_s7   ;;  %s439_s6 = sphi %s468_s6, %s557_s6  }
   0x4   : > { %p38_p0 = scmp.ge.s32.totalorder %s36_s12, 8  ;;  %s40_s13 = sadd.s32 1, %s451_s9 }
   0x5   : > { %p362_p2 = scmp.ge.s32.totalorder %s455_s10, 16 }
   0x6   : > { %s562_s12 = smov (%p38_p0, %s36_s12), 0  ;;  %s564_s13 = smov (!%p38_p0, %s40_s13), %s451_s9 }
   0x7   : > { %p42_p1 = scmp.ge.s32.totalorder %s564_s13, 2  ;;  %54 = sbr.rel (%p362_p2) target bundleno = 15 (0xf), region = 16 }
   0x8   : > { %s56_s14 = sand.u32 (!%p362_p2), 1, %s455_s10   ;;  %s364_s15 = sshll.u32 (!%p362_p2), %s451_s9, 3 }
   0x9   : > { %s566_s13 = smov (%p42_p1, %s564_s13), 0  ;;  %s363_s16 = sshll.u32 (!%p362_p2), %s56_s14, 3 }
   0xa   : > { %s63_s17 = sadd.s32 (!%p362_p2), %s447_s8, %s364_s15  ;;  %s58_s22 = scalar_lea.vmem (!%p362_p2), [#allocation0], %s363_s16 }
   0xb   : > { %s365_s18 = sshll.u32 (!%p362_p2), %s63_s17, 3 }
   0xc   : > { %s65_s21 = scalar_lea.vmem %s555_s0, %s365_s18 }
   0xd   : > { %v94_v0 = vld [vmem:[%s65_s21] sm:$0xff] }
   0xe   : > { %95 = vst [vmem:[%s58_s22] sm:$0xff] %v94_v0 }
   0xf PF: > { %p366_p3 = scmp.ge.s32.totalorder %s455_s10, 1  ;;  %p100_p4 = scmp.lt.s32.totalorder %s455_s10, 17 }
  0x11   : > { %p101_p5 = pnand %p366_p3, %p100_p4 }
  0x13   : > { %104 = sbr.rel (%p101_p5) target bundleno = 1012 (0x3f4), region = 54 }
  0x18   : > { %s107_s23 = sand.u32 1, %s360_s11   ;;  %v118_v1 = vlaneseq  ;;  %v457_v19 = vmov -1.0   ;;  %s370_s26 = sshll.u32 %s443_s7, 3 }
  0x19   : > { %s367_s24 = sshll.u32 %s107_s23, 3  ;;  %s255_s27 = sadd.s32 %s439_s6, %s370_s26 }
  0x1a   : > { %v510_v2 = vand.u32 127, %v118_v1  ;;  %v122_v3 = vshrl.u32 %v118_v1, 7  ;;  %s109_s25 = scalar_lea.vmem [#allocation0], %s367_s24  ;;  %s371_s28 = sshll.u32 %s255_s27, 3 }
  0x1b   : > { %v125_v4 = vld [vmem:[%s109_s25] sm:$0xff]  ;;  %s257_s2 = scalar_lea.vmem %s556_s1, %s371_s28 }
  0x1c   : > { %vm124_vm0 = vcmp.eq.s32.totalorder %v122_v3, %v510_v2  ;;  %vm120_vm1 = vcmp.lt.s32.totalorder %v510_v2, 8  ;;  %vm129_vm2 = vcmp.ge.s32.totalorder %v122_v3, %v510_v2  ;;  %vm156_vm8 = vcmp.eq.s32.totalorder %v510_v2, 0 }
  0x1d   : > { %v126_v5 = vsel %vm124_vm0, %v125_v4, 0.0  ;;  %vm130_vm3 = vmand %vm129_vm2, %vm120_vm1  ;;  %vm153_vm9 = vcmp.eq.s32.totalorder %v510_v2, %v122_v3  ;;  %v157_v20 = vsel %vm156_vm8, 1.0, %v457_v19  ;;  %vm164_vm10 = vcmp.eq.s32.totalorder %v510_v2, 1 }
  0x1e   : > { %127 = vadd.xlane.f32.xlu0 %v126_v5  ;;  %v131_v14 = vsel %vm130_vm3, %v125_v4, 0.0  ;;  %v158_v21 = vsel %vm153_vm9, %v157_v20, 0.0  ;;  %vm174_vm11 = vcmp.eq.s32.totalorder %v510_v2, 2  ;;  %vm184_vm12 = vcmp.eq.s32.totalorder %v510_v2, 3 }
  0x1f   : > { %vm194_vm13 = vcmp.eq.s32.totalorder %v510_v2, 4  ;;  %vm204_vm14 = vcmp.eq.s32.totalorder %v510_v2, 5  ;;  %vm214_vm15 = vcmp.eq.s32.totalorder %v510_v2, 6  ;;  %vm224_vm0 = vcmp.eq.s32.totalorder %v510_v2, 7 }
  0x91   : > { %v513_v6 = vpop.xlane.xlu0 %127 }
  0x92   : > { %415 = vrcp.f32 %v513_v6  ;;  %v143_v10 = vand.u32 2147483648, %v513_v6  ;;  %v141_v12 = vand.u32 2147483647, %v513_v6  ;;  %vm137_vm5 = vweird.f32 %v513_v6 }
  0x94   : > { %v144_v15 = vor.u32 1.1754944e-38, %v143_v10  ;;  %vm142_vm7 = vcmp.eq.f32.partialorder %v141_v12, 8.507059e+37 }
  0x98   : > { %v416_v7 = vpop.eup %415 }
  0x99   : > { %v133_v8 = vmul.f32 %v416_v7, %v513_v6  ;;  %vm138_vm4 = vweird.f32 %v416_v7 }
  0x9a   : > { %vm139_vm6 = vmor %vm137_vm5, %vm138_vm4 }
  0x9b   : > { %v134_v9 = vsub.f32 1.0, %v133_v8 }
  0x9d   : > { %v135_v11 = vmul.f32 %v416_v7, %v134_v9 }
  0x9f   : > { %v136_v13 = vadd.f32 %v416_v7, %v135_v11 }
  0xa1   : > { %v140_v16 = vsel %vm139_vm6, %v416_v7, %v136_v13 }
  0xa2   : > { %v145_v17 = vsel %vm142_vm7, %v144_v15, %v140_v16 }
  0xa3   : > { %v146_v18 = vmul.f32 %v145_v17, %v131_v14 }
  0xa5   : > { %147 = vst [vmem:[#allocation2] sm:$0xff] %v146_v18 }
  0xac   : > { %v160_v22 = vld [vmem:[#allocation2 + $0x1] ss:$0 sm:$0xff]  ;;  %v170_v25 = vld [vmem:[#allocation2 + $0x2] ss:$0 sm:$0xff]  ;;  %v180_v30 = vld [vmem:[#allocation2 + $0x3] ss:$0 sm:$0xff] }
  0xad   : > { %v161_v23 = vxor.u32 2147483648, %v160_v22  ;;  %v171_v27 = vxor.u32 2147483648, %v170_v25  ;;  %v181_v32 = vxor.u32 2147483648, %v180_v30  ;;  %v190_v35 = vld [vmem:[#allocation2 + $0x4] ss:$0 sm:$0xff] }
  0xae   : > { %v191_v37 = vxor.u32 2147483648, %v190_v35  ;;  %v200_v40 = vld [vmem:[#allocation2 + $0x5] ss:$0 sm:$0xff]  ;;  %v210_v45 = vld [vmem:[#allocation2 + $0x6] ss:$0 sm:$0xff] }
  0xaf   : > { %v165_v24 = vmul.f32 %v161_v23, %v158_v21  ;;  %v201_v42 = vxor.u32 2147483648, %v200_v40  ;;  %v211_v47 = vxor.u32 2147483648, %v210_v45  ;;  %v220_v50 = vld [vmem:[#allocation2 + $0x7] ss:$0 sm:$0xff] }
  0xb0   : > { %v221_v52 = vxor.u32 2147483648, %v220_v50 }
  0xb1   : > { %166 = vadd.xlane.f32.xlu0 %v165_v24 }
 0x124   : > { %v167_v26 = vpop.xlane.xlu0 %166 }
 0x125   : > { %v168_v28 = vsel %vm164_vm10, %v167_v26, %v158_v21 }
 0x126   : > { %v175_v29 = vmul.f32 %v171_v27, %v168_v28 }
 0x128   : > { %176 = vadd.xlane.f32.xlu1 %v175_v29 }
 0x19b   : > { %v177_v31 = vpop.xlane.xlu1 %176 }
 0x19c   : > { %v178_v33 = vsel %vm174_vm11, %v177_v31, %v168_v28 }
 0x19d   : > { %v185_v34 = vmul.f32 %v181_v32, %v178_v33 }
 0x19f   : > { %186 = vadd.xlane.f32.xlu1 %v185_v34 }
 0x212   : > { %v187_v36 = vpop.xlane.xlu1 %186 }
 0x213   : > { %v188_v38 = vsel %vm184_vm12, %v187_v36, %v178_v33 }
 0x214   : > { %v195_v39 = vmul.f32 %v191_v37, %v188_v38 }
 0x216   : > { %196 = vadd.xlane.f32.xlu2 %v195_v39 }
 0x289   : > { %v197_v41 = vpop.xlane.xlu2 %196 }
 0x28a   : > { %v198_v43 = vsel %vm194_vm13, %v197_v41, %v188_v38 }
 0x28b   : > { %v205_v44 = vmul.f32 %v201_v42, %v198_v43 }
 0x28d   : > { %206 = vadd.xlane.f32.xlu2 %v205_v44 }
 0x300   : > { %v207_v46 = vpop.xlane.xlu2 %206 }
 0x301   : > { %v208_v48 = vsel %vm204_vm14, %v207_v46, %v198_v43 }
 0x302   : > { %v215_v49 = vmul.f32 %v211_v47, %v208_v48 }
 0x304   : > { %216 = vadd.xlane.f32.xlu0 %v215_v49 }
 0x377   : > { %v217_v51 = vpop.xlane.xlu0 %216 }
 0x378   : > { %v218_v53 = vsel %vm214_vm15, %v217_v51, %v208_v48 }
 0x379   : > { %v225_v54 = vmul.f32 %v221_v52, %v218_v53 }
 0x37b   : > { %226 = vadd.xlane.f32.xlu1 %v225_v54 }
 0x3ee   : > { %v227_v55 = vpop.xlane.xlu1 %226 }
 0x3ef   : > { %v228_v56 = vsel %vm224_vm0, %v227_v55, %v218_v53 }
 0x3f0   : > { %v243_v57 = vmul.f32 %v228_v56, %v145_v17 }
 0x3f2   : > { %v245_v58 = vsel %vm137_vm5, %v228_v56, %v243_v57 }
 0x3f3   : > { %287 = vst [vmem:[%s257_s2] sm:$0xff] %v245_v58 }
 0x3f4 PF: > { %s7_s10 = sadd.s32 1, %s455_s10   ;;  %s557_s6 = smov %s447_s8 }
 0x3f5   : > { %p4_p6 = scmp.ge.s32.totalorder %s7_s10, 18   ;;  %s558_s7 = smov %s451_s9 }
 0x3f6   : > { %s559_s8 = smov %s562_s12  ;;  %s560_s9 = smov %s566_s13 }
 0x3f7   :  { %6 = sbr.rel (!%p4_p6) target bundleno = 3 (0x3), region = 125 }

// kernel: gpvae_forward.1
= control target key start
LH: loop header
LB: loop body
LE: loop exit
PB: predicated region body
PF: predicated region fallthrough
CT: control target
= control target key end

     0   :  { %7 = vsyncpa [#allocation4], 0  ;;  %s1140_s12 = smov [#allocation3]   ;;  %s1141_s14 = smov 128   ;;  %s1628_s0 = inlined_call_operand.vmem [shape: f32[16,128], index: 0, kind: input, shape index: {}, may-alias: {0,2}]   ;;  %s1629_s1 = inlined_call_operand.hbm [shape: f32[232,128], index: 1, kind: input, shape index: {}]   ;;  %s1630_s2 = inlined_call_operand.vmem [shape: f32[16,128], index: 2, kind: output, shape index: {}, may-alias: {0,2}]  }
   0x1   :  { %s14_s11 = sshll.u32 %s1629_s1, 4  ;;  %s16_s13 = sshll.u32 %s1140_s12, 4  ;;  %s15_s11 = int_to_ptr.hbm [resolvable:$true] %s14_s11  ;;  %s17_s13 = int_to_ptr.vmem [resolvable:$true] %s16_s13 }
   0x2   :  { %s1142_s15 = smov 8  }
   0x3   :  { %22 = dma.hbm_to_vmem [thread:$0]  %s15_s11, 3712, %s17_s13, [#allocation4], %s1141_s14, %s1141_s14, %s1142_s15  }
   0x4   :  { %1138 = dma.done.wait [#allocation4], 3712  }
   0x5   :  { %1139 = vsyncadd [#allocation4], 4294963584  ;;  %v31_v0 = vlaneseq  ;;  %v1180_v5 = vld [vmem:[%s1628_s0] sm:$0xff]  ;;  %v1185_v6 = vld [vmem:[%s1628_s0 + $0x8] sm:$0xff]  ;;  %s1143_s19 = smov 16   ;;  %s1144_s0 = smov 32  }
   0x6   :  { %v103_v7 = vld [vmem:[#allocation3 + $0x28] sm:$0xff]  ;;  %78 = vrot.lane.b32.xlu0 %v1180_v5, %s1143_s19  ;;  %80 = vrot.lane.b32.xlu1 %v1185_v6, %s1143_s19  ;;  %v69_v8 = vrot.slane %v1180_v5, 1  ;;  %v70_v9 = vrot.slane %v1185_v6, 1  ;;  %v102_v14 = vld [vmem:[#allocation3 + $0x20] sm:$0xff]  ;;  %v101_v15 = vld [vmem:[#allocation3 + $0x18] sm:$0xff]  ;;  %v61_v23 = vrot.slane %v1185_v6, 7 }
   0x7   :  { %v1173_v1 = vshrl.u32 %v31_v0, 7  ;;  %123 = vmatpush.msra.mxu0 %v103_v7  ;;  %v100_v16 = vld [vmem:[#allocation3 + $0x10] sm:$0xff]  ;;  %v99_v17 = vld [vmem:[#allocation3 + $0x8] sm:$0xff]  ;;  %v98_v18 = vld [vmem:[#allocation3] sm:$0xff]  ;;  %v60_v24 = vrot.slane %v1180_v5, 7  ;;  %vm92_vm5 = vcmask 130048  }
   0x8   :  { %v139_v19 = vld [vmem:[#allocation3 + $0x50] sm:$0xff]  ;;  %v138_v20 = vld [vmem:[#allocation3 + $0x48] sm:$0xff]  ;;  %v137_v21 = vld [vmem:[#allocation3 + $0x40] sm:$0xff]  ;;  %vm95_vm6 = vcmask 261120   ;;  %vm106_vm7 = vcmask 392192   ;;  %s1145_s20 = smov 24  }
   0x9   :  { %v33_v2 = vadd.s32 8, %v1173_v1  ;;  %v38_v3 = vand.u32 7, %v1173_v1  ;;  %vm71_vm0 = vcmp.lt.s32.totalorder %v1173_v1, 7  ;;  %124 = vmatpush.msra.mxu0 %v102_v14  ;;  %v136_v22 = vld [vmem:[#allocation3 + $0x38] sm:$0xff]  ;;  %vm62_vm3 = vcmp.lt.s32.totalorder %v1173_v1, 1  ;;  %v175_v43 = vld [vmem:[#allocation3 + $0x70] sm:$0xff] }
   0xa   :  { %v72_v10 = vsel %vm71_vm0, %v69_v8, %v70_v9  ;;  %v73_v11 = vsel %vm71_vm0, %v70_v9, %v69_v8  ;;  %v64_v26 = vsel %vm62_vm3, %v61_v23, %v60_v24  ;;  %v63_v30 = vsel %vm62_vm3, %v60_v24, %v61_v23  ;;  %v176_v37 = vld [vmem:[#allocation3 + $0x78] sm:$0xff]  ;;  %v1096_v38 = vld [vmem:[#allocation3 + $0x30] ss:$0 sm:$0xff]  ;;  %v174_v44 = vld [vmem:[#allocation3 + $0x68] sm:$0xff]  ;;  %s1146_s21 = smov 112   ;;  %s1147_s22 = smov 96  }
   0xb   :  { %v45_v4 = vand.u32 7, %v33_v2  ;;  %vm67_vm1 = vcmp.eq.s32.totalorder %v38_v3, 7  ;;  %125 = vmatpush.msra.mxu0 %v101_v15  ;;  %vm58_vm4 = vcmp.eq.s32.totalorder %v38_v3, 0  ;;  %197 = vmatpush.msra.mxu2 %v176_v37  ;;  %v173_v45 = vld [vmem:[#allocation3 + $0x60] sm:$0xff]  ;;  %v1097_v46 = vld [vmem:[#allocation3 + $0x58] ss:$0 sm:$0xff] }
   0xc   :  { %v74_v12 = vsel %vm67_vm1, 0.0, %v72_v10  ;;  %v65_v28 = vsel %vm58_vm4, 0.0, %v64_v26  ;;  %1078 = vmatpush.msra.mxu3 %v176_v37  ;;  %v1098_v53 = vld [vmem:[#allocation3 + $0x80] ss:$0 sm:$0xff]  ;;  %s1149_s23 = smov 64   ;;  %s1150_s24 = smov 56  }
   0xd   :  { %vm68_vm2 = vcmp.eq.s32.totalorder %v45_v4, 7  ;;  %126 = vmatpush.msra.mxu0 %v100_v16  ;;  %vm59_vm8 = vcmp.eq.s32.totalorder %v45_v4, 0  ;;  %198 = vmatpush.msra.mxu2 %v175_v43  ;;  %s1152_s7 = smov 48   ;;  %s1153_s8 = smov 40  }
   0xe   :  { %v75_v13 = vsel %vm68_vm2, 0.0, %v73_v11  ;;  %86 = vrot.lane.b32.xlu0 %v74_v12, %s1144_s0  ;;  %v66_v33 = vsel %vm59_vm8, 0.0, %v63_v30  ;;  %1079 = vmatpush.msra.mxu3 %v175_v43 }
   0xf   :  { %88 = vrot.lane.b32.xlu1 %v75_v13, %s1144_s0  ;;  %127 = vmatpush.msra.mxu0 %v99_v17 }
  0x10   :  { %199 = vmatpush.msra.mxu2 %v174_v44  ;;  %1080 = vmatpush.msra.mxu3 %v174_v44 }
  0x11   :  { %128 = vmatpush.msra.mxu0 %v98_v18 }
  0x12   :  { %200 = vmatpush.msra.mxu2 %v173_v45  ;;  %1081 = vmatpush.msra.mxu3 %v173_v45 }
  0x13   :  { %160 = vmatpush.msrb.mxu0 %v139_v19 }
  0x15   :  { %161 = vmatpush.msrb.mxu0 %v138_v20 }
  0x17   :  { %162 = vmatpush.msrb.mxu0 %v137_v21 }
  0x19   :  { %163 = vmatpush.msrb.mxu0 %v136_v22 }
  0x78   :  { %v79_v25 = vpop.permute.xlu0 %78  ;;  %v81_v27 = vpop.permute.xlu1 %80 }
  0x79   :  { %v93_v29 = vsel %vm92_vm5, %v65_v28, %v79_v25  ;;  %v94_v34 = vsel %vm92_vm5, %v66_v33, %v81_v27 }
  0x80   :  { %v87_v31 = vpop.permute.xlu0 %86 }
  0x81   :  { %v96_v32 = vsel %vm95_vm6, %v93_v29, %v87_v31  ;;  %v89_v35 = vpop.permute.xlu1 %88 }
  0x82   :  { %1060 = vmatmul.msk.f32.vlgmr.msra.gmra.mxu0 %vm106_vm7, %v96_v32  ;;  %v97_v36 = vsel %vm95_vm6, %v94_v34, %v89_v35 }
  0x8a   :  { %1061 = vmatmul.msk.f32.gmra.mxu0 %vm106_vm7, %v97_v36 }
  0xff   :  { %v130_v39 = vpop.f32.mrf.mxu0 }
 0x100   :  { %v131_v40 = vadd.f32 %v1096_v38, %v130_v39 }
 0x102   :  { %1062 = vmatmul.msk.f32.vlgmr.msrb.gmra.mxu0 %vm95_vm6, %v131_v40 }
 0x107   :  { %v133_v41 = vpop.f32.mrf.mxu0 }
 0x108   :  { %v134_v42 = vadd.f32 %v1096_v38, %v133_v41 }
 0x10a   :  { %1063 = vmatmul.msk.f32.gmra.mxu0 %vm95_vm6, %v134_v42 }
 0x17f   :  { %v165_v47 = vpop.f32.mrf.mxu0 }
 0x180   :  { %v166_v48 = vadd.f32 %v1097_v46, %v165_v47 }
 0x182   :  { %v171_v49 = vmax.f32 %v166_v48, 0.0 }
 0x184   :  { %1064 = vmatmul.msk.f32.vlgmr.msra.gmra.mxu2 %vm95_vm6, %v171_v49 }
 0x187   :  { %v168_v50 = vpop.f32.mrf.mxu0 }
 0x188   :  { %v169_v51 = vadd.f32 %v1097_v46, %v168_v50 }
 0x18a   :  { %v172_v52 = vmax.f32 %v169_v51, 0.0 }
 0x18c   :  { %1065 = vmatmul.msk.f32.vlgmr.msra.gmra.mxu3 %vm95_vm6, %v172_v52 }
 0x207   :  { %v202_v54 = vpop.f32.mrf.mxu2 }
 0x208   :  { %v1207_v55 = vadd.f32 %v1098_v53, %v202_v54 }
 0x20a   :  { %v208_v56 = vsub.f32 0.0, %v1207_v55 }
 0x20c   :  { %v210_v57 = vmul.f32 1.442695, %v208_v56 }
 0x20e   :  { %1102 = vpow2.f32 %v210_v57 }
 0x20f   :  { %v205_v58 = vpop.f32.mrf.mxu3 }
 0x210   :  { %v1210_v59 = vadd.f32 %v1098_v53, %v205_v58 }
 0x212   :  { %v209_v60 = vsub.f32 0.0, %v1210_v59 }
 0x214   :  { %v1103_v61 = vpop.eup %1102  ;;  %v212_v62 = vmul.f32 1.442695, %v209_v60 }
 0x215   :  { %v214_v63 = vadd.f32 1.0, %v1103_v61 }
 0x216   :  { %1104 = vpow2.f32 %v212_v62 }
 0x217   :  { %1106 = vrcp.f32 %v214_v63  ;;  %v227_v8 = vand.u32 2147483648, %v214_v63  ;;  %v225_v10 = vand.u32 2147483647, %v214_v63  ;;  %vm221_vm10 = vweird.f32 %v214_v63 }
 0x219   :  { %v228_v13 = vor.u32 1.1754944e-38, %v227_v8  ;;  %vm226_vm12 = vcmp.eq.f32.partialorder %v225_v10, 8.507059e+37 }
 0x21c   :  { %v1105_v0 = vpop.eup %1104 }
 0x21d   :  { %v1107_v2 = vpop.eup %1106  ;;  %v215_v3 = vadd.f32 1.0, %v1105_v0 }
 0x21e   :  { %v217_v4 = vmul.f32 %v1107_v2, %v214_v63  ;;  %vm222_vm9 = vweird.f32 %v1107_v2 }
 0x21f   :  { %1108 = vrcp.f32 %v215_v3  ;;  %vm223_vm11 = vmor %vm221_vm10, %vm222_vm9  ;;  %v242_v19 = vand.u32 2147483648, %v215_v3  ;;  %v240_v21 = vand.u32 2147483647, %v215_v3  ;;  %vm236_vm14 = vweird.f32 %v215_v3 }
 0x220   :  { %v218_v7 = vsub.f32 1.0, %v217_v4 }
 0x221   :  { %v243_v23 = vor.u32 1.1754944e-38, %v242_v19  ;;  %vm241_vm0 = vcmp.eq.f32.partialorder %v240_v21, 8.507059e+37 }
 0x222   :  { %v219_v9 = vmul.f32 %v1107_v2, %v218_v7 }
 0x224   :  { %v220_v11 = vadd.f32 %v1107_v2, %v219_v9 }
 0x225   :  { %v1109_v12 = vpop.eup %1108 }
 0x226   :  { %v224_v14 = vsel %vm223_vm11, %v1107_v2, %v220_v11  ;;  %v232_v15 = vmul.f32 %v1109_v12, %v215_v3  ;;  %vm237_vm13 = vweird.f32 %v1109_v12  ;;  %vm306_vm11 = vcmask 57344  }
 0x227   :  { %v1213_v16 = vsel %vm226_vm12, %v228_v13, %v224_v14  ;;  %vm238_vm15 = vmor %vm236_vm14, %vm237_vm13  ;;  %vm405_vm12 = vcmask 60419   ;;  %vm504_vm13 = vcmask 63494   ;;  %vm339_vm14 = vcmask 58369  }
 0x228   :  { %v233_v17 = vsub.f32 1.0, %v232_v15  ;;  %v246_v18 = vadd.f32 1.0, %v1213_v16 }
 0x22a   :  { %v234_v20 = vmul.f32 %v1109_v12, %v233_v17  ;;  %1110 = vrcp.f32 %v246_v18  ;;  %v259_v30 = vand.u32 2147483648, %v246_v18  ;;  %v257_v32 = vand.u32 2147483647, %v246_v18 }
 0x22b   :  { %vm253_vm2 = vweird.f32 %v246_v18 }
 0x22c   :  { %v235_v22 = vadd.f32 %v1109_v12, %v234_v20  ;;  %v260_v35 = vor.u32 1.1754944e-38, %v259_v30  ;;  %vm258_vm4 = vcmp.eq.f32.partialorder %v257_v32, 8.507059e+37 }
 0x22e   :  { %v239_v24 = vsel %vm238_vm15, %v1109_v12, %v235_v22  ;;  %vm438_vm15 = vcmask 61444  }
 0x22f   :  { %v1216_v25 = vsel %vm241_vm0, %v243_v23, %v239_v24  ;;  %vm372_vm0 = vcmask 59394  }
 0x230   :  { %v1111_v26 = vpop.eup %1110  ;;  %v247_v27 = vadd.f32 1.0, %v1216_v25 }
 0x231   :  { %v249_v28 = vmul.f32 %v1111_v26, %v246_v18  ;;  %vm254_vm1 = vweird.f32 %v1111_v26 }
 0x232   :  { %1112 = vrcp.f32 %v247_v27  ;;  %vm255_vm3 = vmor %vm253_vm2, %vm254_vm1  ;;  %v274_v40 = vand.u32 2147483648, %v247_v27  ;;  %v272_v42 = vand.u32 2147483647, %v247_v27  ;;  %vm268_vm8 = vweird.f32 %v247_v27 }
 0x233   :  { %v250_v29 = vsub.f32 1.0, %v249_v28  ;;  %vm546_vm1 = vcmp.eq.s32.totalorder %v1173_v1, 7  ;;  %vm582_vm2 = vcmp.eq.s32.totalorder %v1173_v1, 6 }
 0x234   :  { %v275_v44 = vor.u32 1.1754944e-38, %v274_v40  ;;  %vm273_vm10 = vcmp.eq.f32.partialorder %v272_v42, 8.507059e+37 }
 0x235   :  { %v251_v31 = vmul.f32 %v1111_v26, %v250_v29 }
 0x237   :  { %v252_v33 = vadd.f32 %v1111_v26, %v251_v31 }
 0x238   :  { %v1113_v34 = vpop.eup %1112 }
 0x239   :  { %v256_v36 = vsel %vm255_vm3, %v1111_v26, %v252_v33  ;;  %v264_v37 = vmul.f32 %v1113_v34, %v247_v27  ;;  %vm269_vm7 = vweird.f32 %v1113_v34  ;;  %vm471_vm3 = vcmask 62469  }
 0x23a   :  { %v1219_v38 = vsel %vm258_vm4, %v260_v35, %v256_v36  ;;  %vm270_vm9 = vmor %vm268_vm8, %vm269_vm7  ;;  %vm537_vm4 = vcmask 64519   ;;  %vm835_vm7 = vcmask 64512  }
 0x23b   :  { %290 = vrot.lane.b32.xlu2 %v1219_v38, %s1145_s20  ;;  %v265_v39 = vsub.f32 1.0, %v264_v37 }
 0x23d   :  { %v266_v41 = vmul.f32 %v1113_v34, %v265_v39 }
 0x23f   :  { %v267_v43 = vadd.f32 %v1113_v34, %v266_v41 }
 0x241   :  { %v271_v45 = vsel %vm270_vm9, %v1113_v34, %v267_v43  ;;  %vm1148_vm9 = vmmov 1  }
 0x242   :  { %v1223_v46 = vsel %vm273_vm10, %v275_v44, %v271_v45 }
 0x243   :  { %292 = vrot.lane.b32.xlu2 %v1223_v46, %s1145_s20 }
 0x295   :  { %v1227_v47 = vpop.permute.xlu2 %290 }
 0x296   :  { %v1231_v48 = vmul.f32 %v1227_v47, %v1180_v5 }
 0x298   :  { %309 = vrot.lane.b32.xlu0 %v1231_v48, %s1146_s21 }
 0x29d   :  { %v1235_v49 = vpop.permute.xlu2 %292 }
 0x29e   :  { %v1239_v50 = vmul.f32 %v1235_v49, %v1185_v6 }
 0x2a0   :  { %311 = vrot.lane.b32.xlu1 %v1239_v50, %s1146_s21 }
 0x30a   :  { %v310_v51 = vpop.permute.xlu0 %309 }
 0x30b   :  { %v315_v52 = vmul.f32 %v310_v51, %v1213_v16 }
 0x30d   :  { %v319_v53 = vrot.slane %v315_v52, 7 }
 0x30f   :  { %321 = vrot.lane.b32.xlu2 %v319_v53, %s1143_s19 }
 0x312   :  { %v312_v54 = vpop.permute.xlu1 %311 }
 0x313   :  { %v316_v56 = vmul.f32 %v312_v54, %v1216_v25 }
 0x315   :  { %v320_v57 = vrot.slane %v316_v56, 7 }
 0x317   :  { %323 = vrot.lane.b32.xlu0 %v320_v57, %s1143_s19 }
 0x369   :  { %v322_v58 = vpop.permute.xlu2 %321 }
 0x36a   :  { %v327_v60 = vsub.f32 %v1180_v5, %v322_v58 }
 0x36c   :  { %v1249_v61 = vmul.f32 %v327_v60, %v1227_v47 }
 0x36e   :  { %342 = vrot.lane.b32.xlu1 %v1249_v61, %s1146_s21 }
 0x389   :  { %v324_v62 = vpop.permute.xlu0 %323 }
 0x38a   :  { %v328_v63 = vsub.f32 %v1185_v6, %v324_v62 }
 0x38c   :  { %v1255_v0 = vmul.f32 %v328_v63, %v1235_v49 }
 0x38e   :  { %344 = vrot.lane.b32.xlu2 %v1255_v0, %s1146_s21 }
 0x3e0   :  { %v343_v2 = vpop.permute.xlu1 %342 }
 0x3e1   :  { %v348_v3 = vmul.f32 %v343_v2, %v1213_v16 }
 0x3e3   :  { %v352_v4 = vrot.slane %v348_v3, 7 }
 0x3e5   :  { %354 = vrot.lane.b32.xlu0 %v352_v4, %s1143_s19 }
 0x3e8   :  { %v345_v7 = vpop.permute.xlu2 %344 }
 0x3e9   :  { %v349_v8 = vmul.f32 %v345_v7, %v1216_v25 }
 0x3eb   :  { %v353_v9 = vrot.slane %v349_v8, 7 }
 0x3ed   :  { %356 = vrot.lane.b32.xlu1 %v353_v9, %s1143_s19 }
 0x457   :  { %v355_v10 = vpop.permute.xlu0 %354 }
 0x458   :  { %v360_v11 = vsub.f32 %v1180_v5, %v355_v10 }
 0x45a   :  { %v1265_v12 = vmul.f32 %v360_v11, %v1227_v47 }
 0x45c   :  { %375 = vrot.lane.b32.xlu2 %v1265_v12, %s1146_s21 }
 0x45f   :  { %v357_v13 = vpop.permute.xlu1 %356 }
 0x460   :  { %v361_v14 = vsub.f32 %v1185_v6, %v357_v13 }
 0x462   :  { %v1271_v15 = vmul.f32 %v361_v14, %v1235_v49 }
 0x464   :  { %377 = vrot.lane.b32.xlu0 %v1271_v15, %s1146_s21 }
 0x4b6   :  { %v376_v17 = vpop.permute.xlu2 %375 }
 0x4b7   :  { %v381_v18 = vmul.f32 %v376_v17, %v1213_v16 }
 0x4b9   :  { %v385_v19 = vrot.slane %v381_v18, 7 }
 0x4bb   :  { %387 = vrot.lane.b32.xlu1 %v385_v19, %s1143_s19 }
 0x4d6   :  { %v378_v20 = vpop.permute.xlu0 %377 }
 0x4d7   :  { %v382_v21 = vmul.f32 %v378_v20, %v1216_v25 }
 0x4d9   :  { %v386_v22 = vrot.slane %v382_v21, 7 }
 0x4db   :  { %389 = vrot.lane.b32.xlu2 %v386_v22, %s1143_s19 }
 0x52d   :  { %v388_v23 = vpop.permute.xlu1 %387 }
 0x52e   :  { %v393_v24 = vsub.f32 %v1180_v5, %v388_v23 }
 0x530   :  { %v395_v26 = vmul.f32 %v393_v24, %v1227_v47 }
 0x532   :  { %408 = vrot.lane.b32.xlu0 %v395_v26, %s1146_s21 }
 0x535   :  { %v390_v27 = vpop.permute.xlu2 %389 }
 0x536   :  { %v394_v28 = vsub.f32 %v1185_v6, %v390_v27 }
 0x538   :  { %v1284_v29 = vmul.f32 %v394_v28, %v1235_v49 }
 0x53a   :  { %410 = vrot.lane.b32.xlu1 %v1284_v29, %s1146_s21 }
 0x5a4   :  { %v409_v30 = vpop.permute.xlu0 %408 }
 0x5a5   :  { %v414_v31 = vmul.f32 %v409_v30, %v1213_v16  ;;  %v548_v30 = vperm.slane %v1223_v46, 7 }
 0x5a7   :  { %v418_v32 = vrot.slane %v414_v31, 7 }
 0x5a9   :  { %420 = vrot.lane.b32.xlu2 %v418_v32, %s1143_s19  ;;  %v583_v32 = vperm.slane %v1219_v38, 6 }
 0x5ac   :  { %v411_v33 = vpop.permute.xlu1 %410 }
 0x5ad   :  { %v415_v34 = vmul.f32 %v411_v33, %v1216_v25 }
 0x5af   :  { %v419_v35 = vrot.slane %v415_v34, 7 }
 0x5b1   :  { %422 = vrot.lane.b32.xlu0 %v419_v35, %s1143_s19  ;;  %v585_v35 = vsel %vm582_vm2, %v583_v32, 0.0  ;;  %v728_v32 = vperm.slane %v1223_v46, 2 }
 0x603   :  { %v421_v36 = vpop.permute.xlu2 %420 }
 0x604   :  { %v426_v37 = vsub.f32 %v1180_v5, %v421_v36 }
 0x606   :  { %v428_v39 = vmul.f32 %v426_v37, %v1227_v47  ;;  %v547_v37 = vperm.slane %v1219_v38, 7 }
 0x608   :  { %441 = vrot.lane.b32.xlu1 %v428_v39, %s1146_s21 }
 0x623   :  { %v423_v40 = vpop.permute.xlu0 %422 }
 0x624   :  { %v427_v41 = vsub.f32 %v1185_v6, %v423_v40 }
 0x626   :  { %v429_v42 = vmul.f32 %v427_v41, %v1235_v49 }
 0x628   :  { %443 = vrot.lane.b32.xlu2 %v429_v42, %s1146_s21 }
 0x67a   :  { %v442_v43 = vpop.permute.xlu1 %441 }
 0x67b   :  { %v447_v44 = vmul.f32 %v442_v43, %v1213_v16 }
 0x67d   :  { %v451_v45 = vrot.slane %v447_v44, 7 }
 0x67f   :  { %453 = vrot.lane.b32.xlu0 %v451_v45, %s1143_s19 }
 0x682   :  { %v444_v51 = vpop.permute.xlu2 %443 }
 0x683   :  { %v448_v52 = vmul.f32 %v444_v51, %v1216_v25 }
 0x685   :  { %v452_v53 = vrot.slane %v448_v52, 7 }
 0x687   :  { %455 = vrot.lane.b32.xlu1 %v452_v53, %s1143_s19 }
 0x6f1   :  { %v454_v54 = vpop.permute.xlu0 %453 }
 0x6f2   :  { %v459_v56 = vsub.f32 %v1180_v5, %v454_v54 }
 0x6f4   :  { %v461_v57 = vmul.f32 %v459_v56, %v1227_v47 }
 0x6f6   :  { %474 = vrot.lane.b32.xlu2 %v461_v57, %s1146_s21 }
 0x6f9   :  { %v456_v58 = vpop.permute.xlu1 %455 }
 0x6fa   :  { %v460_v60 = vsub.f32 %v1185_v6, %v456_v58 }
 0x6fc   :  { %v462_v62 = vmul.f32 %v460_v60, %v1235_v49 }
 0x6fe   :  { %476 = vrot.lane.b32.xlu0 %v462_v62, %s1146_s21 }
 0x750   :  { %v475_v63 = vpop.permute.xlu2 %474 }
 0x751   :  { %v480_v2 = vmul.f32 %v475_v63, %v1213_v16 }
 0x753   :  { %v484_v3 = vrot.slane %v480_v2, 7 }
 0x755   :  { %486 = vrot.lane.b32.xlu1 %v484_v3, %s1143_s19 }
 0x770   :  { %v477_v4 = vpop.permute.xlu0 %476 }
 0x771   :  { %v481_v7 = vmul.f32 %v477_v4, %v1216_v25 }
 0x773   :  { %v485_v8 = vrot.slane %v481_v7, 7 }
 0x775   :  { %488 = vrot.lane.b32.xlu2 %v485_v8, %s1143_s19 }
 0x7c7   :  { %v487_v9 = vpop.permute.xlu1 %486 }
 0x7c8   :  { %v492_v10 = vsub.f32 %v1180_v5, %v487_v9 }
 0x7ca   :  { %v494_v11 = vmul.f32 %v492_v10, %v1227_v47 }
 0x7cc   :  { %507 = vrot.lane.b32.xlu0 %v494_v11, %s1146_s21 }
 0x7cf   :  { %v489_v13 = vpop.permute.xlu2 %488 }
 0x7d0   :  { %v493_v14 = vsub.f32 %v1185_v6, %v489_v13 }
 0x7d2   :  { %v495_v17 = vmul.f32 %v493_v14, %v1235_v49 }
 0x7d4   :  { %509 = vrot.lane.b32.xlu1 %v495_v17, %s1146_s21 }
 0x7dc   :  { %300 = vrot.lane.b32.xlu1 %v1231_v48, %s1147_s22 }
 0x7e4   :  { %399 = vrot.lane.b32.xlu1 %v395_v26, %s1147_s22 }
 0x7ec   :  { %498 = vrot.lane.b32.xlu1 %v494_v11, %s1147_s22 }
 0x7f4   :  { %335 = vrot.lane.b32.xlu1 %v1255_v0, %s1147_s22 }
 0x7fc   :  { %434 = vrot.lane.b32.xlu1 %v429_v42, %s1147_s22  ;;  %v832_v42 = vld [vmem:[#allocation3 + $0x88] sm:$0xff] }
 0x7fd   :  { %863 = vmatpush.msrb.mxu3 %v832_v42 }
 0x83e   :  { %v508_v18 = vpop.permute.xlu0 %507 }
 0x83f   :  { %v513_v19 = vmul.f32 %v508_v18, %v1213_v16 }
 0x841   :  { %v517_v20 = vrot.slane %v513_v19, 7 }
 0x843   :  { %519 = vrot.lane.b32.xlu2 %v517_v20, %s1143_s19 }
 0x846   :  { %v510_v21 = vpop.permute.xlu1 %509 }
 0x847   :  { %v514_v22 = vmul.f32 %v510_v21, %v1216_v25 }
 0x849   :  { %v518_v23 = vrot.slane %v514_v22, 7 }
 0x84b   :  { %333 = vrot.lane.b32.xlu2 %v1249_v61, %s1147_s22  ;;  %521 = vrot.lane.b32.xlu0 %v518_v23, %s1143_s19 }
 0x84e   :  { %v301_v48 = vpop.permute.xlu1 %300 }
 0x84f   :  { %307 = vst.msk [vmem:[#allocation2] sm:$0x1] %vm306_vm11, %v301_v48 }
 0x853   :  { %432 = vrot.lane.b32.xlu2 %v428_v39, %s1147_s22  ;;  %366 = vrot.lane.b32.xlu0 %v1265_v12, %s1147_s22  ;;  %v549_v39 = vsel %vm546_vm1, %v547_v37, 0.0 }
 0x856   :  { %v400_v0 = vpop.permute.xlu1 %399 }
 0x857   :  { %406 = vst.msk [vmem:[#allocation2] sm:$0x8] %vm405_vm12, %v400_v0  ;;  %v584_v0 = vperm.slane %v1223_v46, 6 }
 0x85b   :  { %368 = vrot.lane.b32.xlu2 %v1271_v15, %s1147_s22  ;;  %465 = vrot.lane.b32.xlu0 %v461_v57, %s1147_s22 }
 0x85e   :  { %v499_v61 = vpop.permute.xlu1 %498 }
 0x85f   :  { %505 = vst.msk [vmem:[#allocation2] sm:$0x40] %vm504_vm13, %v499_v61  ;;  %v586_v61 = vsel %vm582_vm2, %v584_v0, 0.0  ;;  %vm726_vm2 = vcmp.eq.s32.totalorder %v1173_v1, 2 }
 0x863   :  { %302 = vrot.lane.b32.xlu0 %v1239_v50, %s1147_s22 }
 0x866   :  { %v336_v24 = vpop.permute.xlu1 %335 }
 0x867   :  { %341 = vst.msk [vmem:[#allocation2 + $0x8] sm:$0x2] %vm339_vm14, %v336_v24  ;;  %v619_v24 = vperm.slane %v1219_v38, 5 }
 0x86b   :  { %401 = vrot.lane.b32.xlu0 %v1284_v29, %s1147_s22 }
 0x86e   :  { %v435_v12 = vpop.permute.xlu1 %434 }
 0x86f   :  { %440 = vst.msk [vmem:[#allocation2 + $0x8] sm:$0x10] %vm438_vm15, %v435_v12 }
 0x873   :  { %500 = vrot.lane.b32.xlu0 %v495_v17, %s1147_s22 }
 0x87b   :  { %282 = vrot.lane.b32.xlu0 %v1223_v46, %s1142_s15 }
 0x89d   :  { %v520_v15 = vpop.permute.xlu2 %519 }
 0x89e   :  { %v525_v26 = vsub.f32 %v1180_v5, %v520_v15  ;;  %v620_v15 = vperm.slane %v1223_v46, 5 }
 0x8a0   :  { %v527_v27 = vmul.f32 %v525_v26, %v1227_v47  ;;  %v550_v47 = vsel %vm546_vm1, %v548_v30, 0.0  ;;  %vm690_vm1 = vcmp.eq.s32.totalorder %v1173_v1, 3 }
 0x8a2   :  { %531 = vrot.lane.b32.xlu2 %v527_v27, %s1147_s22  ;;  %v884_v27 = vld [vmem:[#allocation3 + $0xb0] sm:$0xff] }
 0x8a3   :  { %911 = vmatpush.msra.mxu1 %v884_v27  ;;  %v933_v27 = vld [vmem:[#allocation3 + $0xc8] sm:$0xff] }
 0x8a5   :  { %v334_v50 = vpop.permute.xlu2 %333 }
 0x8a6   :  { %340 = vst.msk [vmem:[#allocation2] sm:$0x2] %vm339_vm14, %v334_v50  ;;  %v655_v50 = vperm.slane %v1219_v38, 4 }
 0x8aa   :  { %467 = vrot.lane.b32.xlu2 %v462_v62, %s1147_s22 }
 0x8ad   :  { %v433_v28 = vpop.permute.xlu2 %432 }
 0x8ae   :  { %439 = vst.msk [vmem:[#allocation2] sm:$0x10] %vm438_vm15, %v433_v28  ;;  %vm618_vm15 = vcmp.eq.s32.totalorder %v1173_v1, 5 }
 0x8af   :  { %v621_v12 = vsel %vm618_vm15, %v619_v24, 0.0  ;;  %v622_v26 = vsel %vm618_vm15, %v620_v15, 0.0 }
 0x8b2   :  { %280 = vrot.lane.b32.xlu2 %v1219_v38, %s1142_s15 }
 0x8b5   :  { %v369_v29 = vpop.permute.xlu2 %368 }
 0x8b6   :  { %374 = vst.msk [vmem:[#allocation2 + $0x8] sm:$0x4] %vm372_vm0, %v369_v29  ;;  %v691_v29 = vperm.slane %v1219_v38, 3 }
 0x8b8   :  { %v693_v30 = vsel %vm690_vm1, %v691_v29, 0.0 }
 0x8ba   :  { %555 = vrot.lane.b32.xlu2 %v550_v47, %s1142_s15  ;;  %v883_v47 = vld [vmem:[#allocation3 + $0xa8] sm:$0xff] }
 0x8bb   :  { %912 = vmatpush.msra.mxu1 %v883_v47 }
 0x8bd   :  { %v522_v31 = vpop.permute.xlu0 %521 }
 0x8be   :  { %v526_v33 = vsub.f32 %v1185_v6, %v522_v31  ;;  %v882_v31 = vld [vmem:[#allocation3 + $0xa0] sm:$0xff] }
 0x8bf   :  { %913 = vmatpush.msra.mxu1 %v882_v31 }
 0x8c0   :  { %v528_v34 = vmul.f32 %v526_v33, %v1235_v49  ;;  %v1151_v33 = vmov 0.0  }
 0x8c1   :  { %30 = vst [vmem:[%s1630_s2 + $0x8] sm:$0xff] %v1151_v33 }
 0x8c2   :  { %533 = vrot.lane.b32.xlu1 %v528_v34, %s1147_s22  ;;  %589 = vrot.lane.b32.xlu2 %v585_v35, %s1142_s15  ;;  %v881_v34 = vld [vmem:[#allocation3 + $0x98] sm:$0xff]  ;;  %29 = vst [vmem:[%s1630_s2] sm:$0xff] %v1151_v33  ;;  %v730_v35 = vsel %vm726_vm2, %v728_v32, 0.0 }
 0x8c3   :  { %914 = vmatpush.msra.mxu1 %v881_v34 }
 0x8c5   :  { %v367_v36 = vpop.permute.xlu0 %366 }
 0x8c6   :  { %373 = vst.msk [vmem:[#allocation2] sm:$0x4] %vm372_vm0, %v367_v36  ;;  %vm654_vm0 = vcmp.eq.s32.totalorder %v1173_v1, 4  ;;  %v799_v36 = vperm.slane %v1219_v38, 0 }
 0x8c7   :  { %v657_v28 = vsel %vm654_vm0, %v655_v50, 0.0  ;;  %v932_v50 = vld [vmem:[#allocation3 + $0xc0] sm:$0xff] }
 0x8ca   :  { %553 = vrot.lane.b32.xlu1 %v549_v39, %s1142_s15  ;;  %v1099_v39 = vld [vmem:[#allocation3 + $0x90] ss:$0 sm:$0xff] }
 0x8cd   :  { %v466_v40 = vpop.permute.xlu0 %465 }
 0x8ce   :  { %472 = vst.msk [vmem:[#allocation2] sm:$0x20] %vm471_vm3, %v466_v40 }
 0x8d5   :  { %v303_v49 = vpop.permute.xlu0 %302 }
 0x8d6   :  { %308 = vst.msk [vmem:[#allocation2 + $0x8] sm:$0x1] %vm306_vm11, %v303_v49 }
 0x8dd   :  { %v402_v41 = vpop.permute.xlu0 %401 }
 0x8de   :  { %407 = vst.msk [vmem:[#allocation2 + $0x8] sm:$0x8] %vm405_vm12, %v402_v41 }
 0x8e5   :  { %v501_v43 = vpop.permute.xlu0 %500 }
 0x8e6   :  { %506 = vst.msk [vmem:[#allocation2 + $0x8] sm:$0x40] %vm504_vm13, %v501_v43 }
 0x8ed   :  { %v283_v45 = vpop.permute.xlu0 %282 }
 0x8ee   :  { %v287_v54 = vmul.f32 %v283_v45, %v1216_v25 }
 0x8f0   :  { %v1377_v56 = vsub.f32 0.0, %v287_v54 }
 0x8f2   :  { %v543_v58 = vperm.slane %v1377_v56, 7  ;;  %v579_v2 = vperm.slane %v1377_v56, 6 }
 0x8f4   :  { %v545_v60 = vmul.f32 0.0, %v543_v58 }
 0x8fc   :  { %v532_v44 = vpop.permute.xlu2 %531 }
 0x8fd   :  { %538 = vst.msk [vmem:[#allocation2] sm:$0x80] %vm537_vm4, %v532_v44 }
 0x904   :  { %v468_v51 = vpop.permute.xlu2 %467  ;;  %v540_v52 = vld [vmem:[#allocation2] sm:$0xff] }
 0x905   :  { %473 = vst.msk [vmem:[#allocation2 + $0x8] sm:$0x20] %vm471_vm3, %v468_v51  ;;  %v830_v53 = vadd.f32 %v540_v52, %v1207_v55  ;;  %vm798_vm3 = vcmp.eq.s32.totalorder %v1173_v1, 0  ;;  %v615_v52 = vperm.slane %v1377_v56, 5 }
 0x906   :  { %v801_v37 = vsel %vm798_vm3, %v799_v36, 0.0 }
 0x907   :  { %1066 = vmatmul.msk.f32.vlgmr.msrb.gmra.mxu3 %vm835_vm7, %v830_v53 }
 0x90c   :  { %v281_v57 = vpop.permute.xlu2 %280 }
 0x90d   :  { %v286_v25 = vmul.f32 %v281_v57, %v1213_v16 }
 0x90f   :  { %v1385_v7 = vsub.f32 0.0, %v286_v25 }
 0x911   :  { %v542_v9 = vperm.slane %v1385_v7, 7  ;;  %v578_v17 = vperm.slane %v1385_v7, 6  ;;  %v614_v22 = vperm.slane %v1385_v7, 5 }
 0x913   :  { %v544_v10 = vmul.f32 0.0, %v542_v9 }
 0x914   :  { %v556_v62 = vpop.permute.xlu2 %555 }
 0x915   :  { %v560_v63 = vadd.f32 %v556_v62, %v545_v60 }
 0x917   :  { %vm562_vm8 = vweird.f32 %v560_v63  ;;  %v1381_v3 = vmul.f32 %v579_v2, %v560_v63  ;;  %v650_v2 = vperm.slane %v1385_v7, 4 }
 0x918   :  { %vm564_vm10 = vmxor %vm562_vm8, %vm1148_vm9 }
 0x919   :  { %v566_v4 = vsel %vm564_vm10, %v560_v63, 0.0 }
 0x91a   :  { %571 = vrot.lane.b32.xlu1 %v566_v4, %s1149_s23 }
 0x91c   :  { %v590_v16 = vpop.permute.xlu2 %589 }
 0x934   :  { %v534_v8 = vpop.permute.xlu1 %533 }
 0x935   :  { %539 = vst.msk [vmem:[#allocation2 + $0x8] sm:$0x80] %vm537_vm4, %v534_v8  ;;  %vm575_vm4 = vcmask 720512  }
 0x93c   :  { %v554_v11 = vpop.permute.xlu1 %553  ;;  %v541_v13 = vld [vmem:[#allocation2 + $0x8] sm:$0xff] }
 0x93d   :  { %v559_v14 = vadd.f32 %v554_v11, %v544_v10  ;;  %v831_v18 = vadd.f32 %v541_v13, %v1210_v59  ;;  %v935_v10 = vld [vmem:[#allocation3 + $0xd8] sm:$0xff] }
 0x93e   :  { %962 = vmatpush.msrb.mxu2 %v935_v10 }
 0x93f   :  { %v580_v19 = vmul.f32 %v578_v17, %v559_v14  ;;  %1067 = vmatmul.msk.f32.gmra.mxu3 %vm835_vm7, %v831_v18  ;;  %vm561_vm11 = vweird.f32 %v559_v14 }
 0x940   :  { %vm563_vm12 = vmxor %vm561_vm11, %vm1148_vm9 }
 0x941   :  { %v565_v20 = vsel %vm563_vm12, %v559_v14, 0.0  ;;  %v595_v21 = vadd.f32 %v590_v16, %v580_v19  ;;  %v651_v14 = vperm.slane %v1377_v56, 4 }
 0x942   :  { %569 = vrot.lane.b32.xlu0 %v565_v20, %s1149_s23 }
 0x943   :  { %vm597_vm13 = vweird.f32 %v595_v21  ;;  %v1394_v23 = vmul.f32 %v614_v22, %v595_v21 }
 0x944   :  { %vm599_vm14 = vmxor %vm597_vm13, %vm1148_vm9 }
 0x945   :  { %v601_v48 = vsel %vm599_vm14, %v595_v21, 0.0 }
 0x946   :  { %605 = vrot.lane.b32.xlu1 %v601_v48, %s1150_s24 }
 0x947   :  { %1068 = vmatmul.msk.f32.gmra.mxu3 %vm835_vm7, %v1207_v55 }
 0x94a   :  { %591 = vrot.lane.b32.xlu0 %v586_v61, %s1142_s15 }
 0x94f   :  { %1069 = vmatmul.msk.f32.gmra.mxu3 %vm835_vm7, %v1210_v59  ;;  %vm611_vm7 = vcmask 654912  }
 0x952   :  { %625 = vrot.lane.b32.xlu0 %v621_v12, %s1142_s15  ;;  %v722_v12 = vperm.slane %v1385_v7, 2 }
 0x95a   :  { %627 = vrot.lane.b32.xlu0 %v622_v26, %s1142_s15  ;;  %v934_v26 = vld [vmem:[#allocation3 + $0xd0] sm:$0xff] }
 0x95b   :  { %963 = vmatpush.msrb.mxu2 %v934_v26  ;;  %v723_v26 = vperm.slane %v1377_v56, 2 }
 0x95d   :  { %964 = vmatpush.msrb.mxu2 %v933_v27 }
 0x95f   :  { %965 = vmatpush.msrb.mxu2 %v932_v50 }
 0x962   :  { %661 = vrot.lane.b32.xlu0 %v657_v28, %s1142_s15  ;;  %v1100_v28 = vld [vmem:[#allocation3 + $0xb8] ss:$0 sm:$0xff] }
 0x96a   :  { %697 = vrot.lane.b32.xlu0 %v693_v30, %s1142_s15 }
 0x972   :  { %735 = vrot.lane.b32.xlu0 %v730_v35, %s1142_s15 }
 0x97a   :  { %805 = vrot.lane.b32.xlu0 %v801_v37, %s1142_s15 }
 0x98a   :  { %v865_v40 = vpop.f32.mrf.mxu3 }
 0x98b   :  { %v866_v49 = vadd.f32 %v1099_v39, %v865_v40 }
 0x98c   :  { %v572_v41 = vpop.permute.xlu1 %571 }
 0x98d   :  { %v877_v42 = vmax.f32 %v866_v49, 0.0  ;;  %577 = vst.msk [vmem:[%s1630_s2 + $0x8] sm:$0xff] %vm575_vm4, %v572_v41 }
 0x98f   :  { %1070 = vmatmul.msk.f32.vlgmr.msra.gmra.mxu1 %vm95_vm6, %v877_v42 }
 0x9b4   :  { %v570_v43 = vpop.permute.xlu0 %569 }
 0x9b5   :  { %576 = vst.msk [vmem:[%s1630_s2] sm:$0xff] %vm575_vm4, %v570_v43 }
 0x9b8   :  { %v606_v44 = vpop.permute.xlu1 %605 }
 0x9b9   :  { %612 = vst.msk [vmem:[%s1630_s2] sm:$0xff] %vm611_vm7, %v606_v44  ;;  %v1489_v44 = vld [vmem:[#allocation3 + $0xe0] ss:$0 sm:$0xff] }
 0x9bc   :  { %v592_v45 = vpop.permute.xlu0 %591 }
 0x9bd   :  { %v596_v51 = vadd.f32 %v592_v45, %v1381_v3 }
 0x9bf   :  { %vm598_vm8 = vweird.f32 %v596_v51  ;;  %v617_v53 = vmul.f32 %v615_v52, %v596_v51 }
 0x9c0   :  { %vm600_vm10 = vmxor %vm598_vm8, %vm1148_vm9  ;;  %vm647_vm8 = vcmask 589312  }
 0x9c1   :  { %v602_v54 = vsel %vm600_vm10, %v596_v51, 0.0  ;;  %vm683_vm10 = vcmask 523712  }
 0x9c2   :  { %v868_v57 = vpop.f32.mrf.mxu3  ;;  %607 = vrot.lane.b32.xlu2 %v602_v54, %s1150_s24 }
 0x9c3   :  { %v869_v58 = vadd.f32 %v1099_v39, %v868_v57 }
 0x9c4   :  { %v626_v60 = vpop.permute.xlu0 %625 }
 0x9c5   :  { %v878_v62 = vmax.f32 %v869_v58, 0.0  ;;  %v631_v63 = vadd.f32 %v626_v60, %v1394_v23  ;;  %v686_v23 = vperm.slane %v1385_v7, 3  ;;  %v656_v60 = vperm.slane %v1223_v46, 4 }
 0x9c7   :  { %1071 = vmatmul.msk.f32.gmra.mxu1 %vm95_vm6, %v878_v62  ;;  %vm633_vm11 = vweird.f32 %v631_v63  ;;  %v652_v3 = vmul.f32 %v650_v2, %v631_v63  ;;  %v658_v62 = vsel %vm654_vm0, %v656_v60, 0.0 }
 0x9c8   :  { %vm635_vm12 = vmxor %vm633_vm11, %vm1148_vm9 }
 0x9c9   :  { %v637_v4 = vsel %vm635_vm12, %v631_v63, 0.0  ;;  %v692_v63 = vperm.slane %v1223_v46, 3 }
 0x9ca   :  { %v871_v25 = vpop.f32.mrf.mxu3  ;;  %641 = vrot.lane.b32.xlu1 %v637_v4, %s1152_s7 }
 0x9cb   :  { %v872_v8 = vadd.f32 %v1099_v39, %v871_v25  ;;  %v694_v2 = vsel %vm690_vm1, %v692_v63, 0.0  ;;  %v800_v25 = vperm.slane %v1223_v46, 0 }
 0x9cc   :  { %v628_v9 = vpop.permute.xlu0 %627 }
 0x9cd   :  { %v879_v11 = vmax.f32 %v872_v8, 0.0  ;;  %v632_v13 = vadd.f32 %v628_v9, %v617_v53  ;;  %v802_v8 = vsel %vm798_vm3, %v800_v25, 0.0 }
 0x9cf   :  { %1072 = vmatmul.msk.f32.gmra.mxu1 %vm95_vm6, %v879_v11  ;;  %vm634_vm13 = vweird.f32 %v632_v13  ;;  %v1458_v17 = vmul.f32 %v651_v14, %v632_v13 }
 0x9d0   :  { %vm636_vm14 = vmxor %vm634_vm13, %vm1148_vm9 }
 0x9d1   :  { %v638_v18 = vsel %vm636_vm14, %v632_v13, 0.0 }
 0x9d2   :  { %v874_v19 = vpop.f32.mrf.mxu3  ;;  %643 = vrot.lane.b32.xlu2 %v638_v18, %s1152_s7 }
 0x9d3   :  { %v875_v16 = vadd.f32 %v1099_v39, %v874_v19 }
 0x9d4   :  { %v662_v20 = vpop.permute.xlu0 %661 }
 0x9d5   :  { %v880_v21 = vmax.f32 %v875_v16, 0.0  ;;  %v667_v22 = vadd.f32 %v662_v20, %v652_v3  ;;  %v763_v3 = vperm.slane %v1219_v38, 1  ;;  %v727_v16 = vperm.slane %v1219_v38, 2 }
 0x9d7   :  { %1073 = vmatmul.msk.f32.gmra.mxu1 %vm95_vm6, %v880_v21  ;;  %vm669_vm15 = vweird.f32 %v667_v22  ;;  %v688_v48 = vmul.f32 %v686_v23, %v667_v22  ;;  %v729_v20 = vsel %vm726_vm2, %v727_v16, 0.0  ;;  %v764_v21 = vperm.slane %v1223_v46, 1 }
 0x9d8   :  { %vm671_vm4 = vmxor %vm669_vm15, %vm1148_vm9 }
 0x9d9   :  { %v673_v0 = vsel %vm671_vm4, %v667_v22, 0.0 }
 0x9da   :  { %677 = vrot.lane.b32.xlu2 %v673_v0, %s1153_s8 }
 0x9dc   :  { %v698_v61 = vpop.permute.xlu0 %697 }
 0x9dd   :  { %v1465_v24 = vadd.f32 %v698_v61, %v688_v48  ;;  %v687_v61 = vperm.slane %v1377_v56, 3 }
 0x9df   :  { %v1469_v15 = vmul.f32 %v722_v12, %v1465_v24  ;;  %vm705_vm3 = vweird.f32 %v1465_v24 }
 0x9e0   :  { %vm707_vm12 = vmxor %vm705_vm3, %vm1148_vm9 }
 0x9e1   :  { %v709_v23 = vsel %vm707_vm12, %v1465_v24, 0.0 }
 0x9e4   :  { %v736_v50 = vpop.permute.xlu0 %735 }
 0xa0c   :  { %v916_v29 = vpop.f32.mrf.mxu1 }
 0xa0d   :  { %v917_v30 = vadd.f32 %v1100_v28, %v916_v29  ;;  %v759_v29 = vperm.slane %v1377_v56, 1 }
 0xa0f   :  { %v928_v47 = vmax.f32 %v917_v30, 0.0 }
 0xa11   :  { %1074 = vmatmul.msk.f32.vlgmr.msrb.gmra.mxu2 %vm95_vm6, %v928_v47 }
 0xa1c   :  { %v608_v31 = vpop.permute.xlu2 %607 }
 0xa1d   :  { %613 = vst.msk [vmem:[%s1630_s2 + $0x8] sm:$0xff] %vm611_vm7, %v608_v31 }
 0xa2c   :  { %v644_v32 = vpop.permute.xlu2 %643 }
 0xa2d   :  { %649 = vst.msk [vmem:[%s1630_s2 + $0x8] sm:$0xff] %vm647_vm8, %v644_v32 }
 0xa34   :  { %v678_v34 = vpop.permute.xlu2 %677 }
 0xa3c   :  { %v642_v33 = vpop.permute.xlu1 %641 }
 0xa3d   :  { %648 = vst.msk [vmem:[%s1630_s2] sm:$0xff] %vm647_vm8, %v642_v33 }
 0xa3e   :  { %684 = vst.msk [vmem:[%s1630_s2] sm:$0xff] %vm683_vm10, %v678_v34 }
 0xa44   :  { %v919_v35 = vpop.f32.mrf.mxu1 }
 0xa45   :  { %v920_v36 = vadd.f32 %v1100_v28, %v919_v35  ;;  %v758_v35 = vperm.slane %v1385_v7, 1 }
 0xa47   :  { %v929_v37 = vmax.f32 %v920_v36, 0.0 }
 0xa49   :  { %1075 = vmatmul.msk.f32.gmra.mxu2 %vm95_vm6, %v929_v37 }
 0xa4c   :  { %v922_v39 = vpop.f32.mrf.mxu1 }
 0xa4d   :  { %v923_v40 = vadd.f32 %v1100_v28, %v922_v39 }
 0xa4f   :  { %v930_v49 = vmax.f32 %v923_v40, 0.0 }
 0xa51   :  { %1076 = vmatmul.msk.f32.gmra.mxu2 %vm95_vm6, %v930_v49 }
 0xa54   :  { %v925_v41 = vpop.f32.mrf.mxu1 }
 0xa55   :  { %v926_v42 = vadd.f32 %v1100_v28, %v925_v41  ;;  %v794_v41 = vperm.slane %v1385_v7, 0 }
 0xa57   :  { %v931_v43 = vmax.f32 %v926_v42, 0.0 }
 0xa59   :  { %1077 = vmatmul.msk.f32.gmra.mxu2 %vm95_vm6, %v931_v43  ;;  %vm762_vm6 = vcmp.eq.s32.totalorder %v1173_v1, 1  ;;  %v806_v43 = vpop.permute.xlu0 %805 }
 0xa5a   :  { %v765_v4 = vsel %vm762_vm6, %v763_v3, 0.0  ;;  %v766_v22 = vsel %vm762_vm6, %v764_v21, 0.0 }
 0xa94   :  { %v967_v45 = vpop.f32.mrf.mxu2 }
 0xa95   :  { %v968_v51 = vadd.f32 %v1489_v44, %v967_v45 }
 0xa97   :  { %v979_v52 = vsub.f32 %v1180_v5, %v968_v51 }
 0xa99   :  { %v981_v53 = vmul.f32 %v979_v52, %v979_v52 }
 0xa9b   :  { %v983_v54 = vmul.f32 0.5, %v981_v53  ;;  %v795_v53 = vperm.slane %v1377_v56, 0 }
 0xa9d   :  { %v985_v57 = vadd.f32 0.9189385, %v983_v54 }
 0xa9f   :  { %vm987_vm7 = vweird.f32 %v985_v57 }
 0xaa0   :  { %vm989_vm11 = vmxor %vm987_vm7, %vm1148_vm9  ;;  %vm993_vm7 = vcmp.gt.f32.partialorder %v1180_v5, 0.5 }
 0xaa1   :  { %v991_v58 = vsel %vm989_vm11, %v985_v57, 0.0  ;;  %vm994_vm11 = vcmp.gt.f32.partialorder %v1185_v6, 0.5 }
 0xaa2   :  { %997 = vrot.lane.b32.xlu1 %v991_v58, %s1143_s19  ;;  %v1031_v58 = vsub.f32 1.0, %v1180_v5 }
 0xaaa   :  { %663 = vrot.lane.b32.xlu1 %v658_v62, %s1142_s15  ;;  %v1032_v62 = vsub.f32 1.0, %v1185_v6 }
 0xab2   :  { %699 = vrot.lane.b32.xlu1 %v694_v2, %s1142_s15 }
 0xaba   :  { %769 = vrot.lane.b32.xlu1 %v765_v4, %s1142_s15 }
 0xac2   :  { %807 = vrot.lane.b32.xlu1 %v802_v8, %s1142_s15 }
 0xacc   :  { %v970_v9 = vpop.f32.mrf.mxu2 }
 0xacd   :  { %v971_v10 = vadd.f32 %v1489_v44, %v970_v9 }
 0xacf   :  { %v980_v11 = vsub.f32 %v1185_v6, %v971_v10 }
 0xad1   :  { %v982_v13 = vmul.f32 %v980_v11, %v980_v11 }
 0xad3   :  { %v984_v14 = vmul.f32 0.5, %v982_v13 }
 0xad4   :  { %v973_v16 = vpop.f32.mrf.mxu2 }
 0xad5   :  { %v986_v18 = vadd.f32 0.9189385, %v984_v14 }
 0xad7   :  { %vm988_vm0 = vweird.f32 %v986_v18 }
 0xad8   :  { %vm990_vm1 = vmxor %vm988_vm0, %vm1148_vm9 }
 0xad9   :  { %v992_v19 = vsel %vm990_vm1, %v986_v18, 0.0 }
 0xada   :  { %999 = vrot.lane.b32.xlu2 %v992_v19, %s1143_s19 }
 0xae2   :  { %733 = vrot.lane.b32.xlu2 %v729_v20, %s1142_s15 }
 0xaea   :  { %771 = vrot.lane.b32.xlu2 %v766_v22, %s1142_s15  ;;  %v974_v22 = vadd.f32 %v1489_v44, %v973_v16 }
 0xaf2   :  { %713 = vrot.lane.b32.xlu2 %v709_v23, %s1144_s0 }
 0xb14   :  { %v998_v38 = vpop.permute.xlu1 %997 }
 0xb15   :  { %v1003_v32 = vsel %vm993_vm7, %v998_v38, 0.0  ;;  %vm827_vm7 = vcmask 261312  }
 0xb1c   :  { %v664_v48 = vpop.permute.xlu1 %663 }
 0xb1d   :  { %v668_v0 = vadd.f32 %v664_v48, %v1458_v17 }
 0xb1f   :  { %vm670_vm2 = vweird.f32 %v668_v0  ;;  %v689_v46 = vmul.f32 %v687_v61, %v668_v0 }
 0xb20   :  { %vm672_vm13 = vmxor %vm670_vm2, %vm1148_vm9 }
 0xb21   :  { %v674_v1 = vsel %vm672_vm13, %v668_v0, 0.0 }
 0xb22   :  { %679 = vrot.lane.b32.xlu1 %v674_v1, %s1153_s8 }
 0xb24   :  { %v700_v12 = vpop.permute.xlu1 %699 }
 0xb25   :  { %v704_v27 = vadd.f32 %v700_v12, %v689_v46  ;;  %v976_v46 = vpop.f32.mrf.mxu2 }
 0xb26   :  { %v977_v1 = vadd.f32 %v1489_v44, %v976_v46 }
 0xb27   :  { %v725_v24 = vmul.f32 %v723_v26, %v704_v27  ;;  %vm706_vm14 = vweird.f32 %v704_v27 }
 0xb28   :  { %vm708_vm15 = vmxor %vm706_vm14, %vm1148_vm9 }
 0xb29   :  { %v710_v28 = vsel %vm708_vm15, %v704_v27, 0.0  ;;  %v740_v17 = vadd.f32 %v736_v50, %v725_v24  ;;  %vm719_vm15 = vcmask 458112  }
 0xb2a   :  { %715 = vrot.lane.b32.xlu0 %v710_v28, %s1144_s0 }
 0xb2b   :  { %vm742_vm4 = vweird.f32 %v740_v17  ;;  %v761_v30 = vmul.f32 %v759_v29, %v740_v17 }
 0xb2c   :  { %vm744_vm8 = vmxor %vm742_vm4, %vm1148_vm9  ;;  %v770_v39 = vpop.permute.xlu1 %769 }
 0xb2d   :  { %v746_v47 = vsel %vm744_vm8, %v740_v17, 0.0 }
 0xb2e   :  { %751 = vrot.lane.b32.xlu2 %v746_v47, %s1145_s20 }
 0xb34   :  { %v1000_v31 = vpop.permute.xlu2 %999  ;;  %v808_v56 = vpop.permute.xlu1 %807 }
 0xb35   :  { %v1004_v33 = vsel %vm994_vm11, %v1000_v31, 0.0  ;;  %vm1019_vm11 = vcmask 728768  }
 0xb36   :  { %1007 = vrot.lane.b32.xlu2 %v1003_v32, %s1146_s21  ;;  %1009 = vrot.lane.b32.xlu0 %v1004_v33, %s1146_s21 }
 0xb3c   :  { %v734_v34 = vpop.permute.xlu2 %733 }
 0xb3d   :  { %v739_v36 = vadd.f32 %v734_v34, %v1469_v15 }
 0xb3f   :  { %v760_v37 = vmul.f32 %v758_v35, %v739_v36  ;;  %vm741_vm6 = vweird.f32 %v739_v36 }
 0xb40   :  { %vm743_vm0 = vmxor %vm741_vm6, %vm1148_vm9  ;;  %vm1028_vm6 = vcmask 195712  }
 0xb41   :  { %v745_v40 = vsel %vm743_vm0, %v739_v36, 0.0  ;;  %v775_v49 = vadd.f32 %v770_v39, %v760_v37 }
 0xb42   :  { %749 = vrot.lane.b32.xlu1 %v745_v40, %s1145_s20 }
 0xb43   :  { %vm777_vm1 = vweird.f32 %v775_v49  ;;  %v796_v42 = vmul.f32 %v794_v41, %v775_v49 }
 0xb44   :  { %v772_v45 = vpop.permute.xlu2 %771  ;;  %vm779_vm3 = vmxor %vm777_vm1, %vm1148_vm9 }
 0xb45   :  { %v776_v51 = vadd.f32 %v772_v45, %v761_v30  ;;  %v781_v52 = vsel %vm779_vm3, %v775_v49, 0.0  ;;  %v811_v15 = vadd.f32 %v806_v43, %v796_v42 }
 0xb46   :  { %785 = vrot.lane.b32.xlu0 %v781_v52, %s1143_s19 }
 0xb47   :  { %vm813_vm12 = vweird.f32 %v811_v15  ;;  %vm778_vm2 = vweird.f32 %v776_v51  ;;  %v797_v54 = vmul.f32 %v795_v53, %v776_v51 }
 0xb48   :  { %vm815_vm13 = vmxor %vm813_vm12, %vm1148_vm9 }
 0xb49   :  { %v817_v7 = vsel %vm815_vm13, %v811_v15, 0.0  ;;  %vm780_vm14 = vmxor %vm778_vm2, %vm1148_vm9  ;;  %v812_v63 = vadd.f32 %v808_v56, %v797_v54 }
 0xb4a   :  { %821 = vrot.lane.b32.xlu2 %v817_v7, %s1142_s15  ;;  %v782_v57 = vsel %vm780_vm14, %v776_v51, 0.0 }
 0xb4b   :  { %787 = vrot.lane.b32.xlu1 %v782_v57, %s1143_s19  ;;  %vm814_vm4 = vweird.f32 %v812_v63 }
 0xb4c   :  { %v714_v60 = vpop.permute.xlu2 %713  ;;  %vm816_vm8 = vmxor %vm814_vm4, %vm1148_vm9  ;;  %vm755_vm9 = vcmask 392512  }
 0xb4d   :  { %720 = vst.msk [vmem:[%s1630_s2] sm:$0xff] %vm719_vm15, %v714_v60  ;;  %v818_v2 = vsel %vm816_vm8, %v812_v63, 0.0 }
 0xb4e   :  { %1035 = vrot.lane.b32.xlu0 %v1031_v58, %s1146_s21 }
 0xb52   :  { %1043 = vrot.lane.b32.xlu2 %v1180_v5, %s1146_s21 }
 0xb53   :  { %1037 = vrot.lane.b32.xlu1 %v1032_v62, %s1146_s21 }
 0xb56   :  { %1045 = vrot.lane.b32.xlu0 %v1185_v6, %s1146_s21 }
 0xb5b   :  { %823 = vrot.lane.b32.xlu1 %v818_v2, %s1142_s15 }
 0xb63   :  { %1022 = vrot.lane.b32.xlu1 %v1207_v55, %s1143_s19 }
 0xb6b   :  { %1024 = vrot.lane.b32.xlu1 %v1210_v59, %s1143_s19 }
 0xb88   :  { %v752_v3 = vpop.permute.xlu2 %751 }
 0xb90   :  { %v1008_v4 = vpop.permute.xlu2 %1007 }
 0xb91   :  { %v1013_v25 = vsel %vm92_vm5, %v1008_v4, 0.0 }
 0xb92   :  { %1014 = vadd.xlane.f32.xlu2 %v1013_v25 }
 0xb94   :  { %v680_v8 = vpop.permute.xlu1 %679 }
 0xb95   :  { %685 = vst.msk [vmem:[%s1630_s2 + $0x8] sm:$0xff] %vm683_vm10, %v680_v8  ;;  %vm791_vm10 = vcmask 326912  }
 0xb9c   :  { %v716_v9 = vpop.permute.xlu0 %715 }
 0xb9d   :  { %721 = vst.msk [vmem:[%s1630_s2 + $0x8] sm:$0xff] %vm719_vm15, %v716_v9 }
 0xb9e   :  { %757 = vst.msk [vmem:[%s1630_s2 + $0x8] sm:$0xff] %vm755_vm9, %v752_v3 }
 0xba4   :  { %v822_v13 = vpop.permute.xlu2 %821 }
 0xba8   :  { %v1010_v55 = vpop.permute.xlu0 %1009 }
 0xba9   :  { %v1016_v59 = vsel %vm92_vm5, %v1010_v55, 0.0 }
 0xbaa   :  { %1017 = vadd.xlane.f32.xlu0 %v1016_v59 }
 0xbac   :  { %v1044_v20 = vpop.permute.xlu2 %1043 }
 0xbad   :  { %v1049_v38 = vmul.f32 %v1044_v20, %v1180_v5 }
 0xbb4   :  { %v750_v10 = vpop.permute.xlu1 %749 }
 0xbb5   :  { %756 = vst.msk [vmem:[%s1630_s2] sm:$0xff] %vm755_vm9, %v750_v10 }
 0xbb8   :  { %v786_v11 = vpop.permute.xlu0 %785 }
 0xbb9   :  { %792 = vst.msk [vmem:[%s1630_s2] sm:$0xff] %vm791_vm10, %v786_v11 }
 0xbba   :  { %828 = vst.msk [vmem:[%s1630_s2] sm:$0xff] %vm827_vm7, %v822_v13 }
 0xbbd   :  { %v788_v14 = vpop.permute.xlu1 %787 }
 0xbbe   :  { %793 = vst.msk [vmem:[%s1630_s2 + $0x8] sm:$0xff] %vm791_vm10, %v788_v14 }
 0xbc0   :  { %v1036_v21 = vpop.permute.xlu0 %1035 }
 0xbc1   :  { %v1041_v23 = vmul.f32 %v1036_v21, %v974_v22 }
 0xbc3   :  { %v1051_v0 = vadd.f32 %v1049_v38, %v1041_v23 }
 0xbc5   :  { %v1038_v18 = vpop.permute.xlu1 %1037 }
 0xbc6   :  { %v1042_v26 = vmul.f32 %v1038_v18, %v977_v1 }
 0xbc8   :  { %v1046_v5 = vpop.permute.xlu0 %1045 }
 0xbc9   :  { %v1050_v12 = vmul.f32 %v1046_v5, %v1185_v6 }
 0xbcb   :  { %v1052_v24 = vadd.f32 %v1050_v12, %v1042_v26 }
 0xbcd   :  { %v824_v19 = vpop.permute.xlu1 %823 }
 0xbce   :  { %829 = vst.msk [vmem:[%s1630_s2 + $0x8] sm:$0xff] %vm827_vm7, %v824_v19 }
 0xbd5   :  { %v1023_v61 = vpop.permute.xlu1 %1022 }
 0xbdd   :  { %v1025_v50 = vpop.permute.xlu1 %1024 }
 0xc05   :  { %v1015_v48 = vpop.xlane.xlu2 %1014 }
 0xc06   :  { %1020 = vst.msk [vmem:[%s1630_s2] sm:$0xff] %vm1019_vm11, %v1015_v48 }
 0xc07   :  { %1029 = vst.msk [vmem:[%s1630_s2] sm:$0xff] %vm1028_vm6, %v1023_v61 }
 0xc08   :  { %1053 = vst.msk [vmem:[%s1630_s2] sm:$0xff] %vm92_vm5, %v1051_v0 }
 0xc1d   :  { %v1018_v27 = vpop.xlane.xlu0 %1017 }
 0xc1e   :  { %1021 = vst.msk [vmem:[%s1630_s2 + $0x8] sm:$0xff] %vm1019_vm11, %v1018_v27 }
 0xc1f   :  { %1030 = vst.msk [vmem:[%s1630_s2 + $0x8] sm:$0xff] %vm1028_vm6, %v1025_v50 }
 0xc20   :  { %1054 = vst.msk [vmem:[%s1630_s2 + $0x8] sm:$0xff] %vm92_vm5, %v1052_v24 }
 0xc21   :  { %1059 = vsyncpa [#allocation4], 1 }

</bundles_post_ra>
